<compile_context>
chip_gen: v5e
topology: v5e:2x2
jax: 0.10.0
libtpu: 0.0.40
codegen_flags: <defaults>
</compile_context>

<pallas_src>
import functools

import jax
import jax.numpy as jnp
from jax.experimental import pallas as pl
from jax.experimental.pallas import tpu as pltpu


def _flash_attn_kernel(xq_ref, xkv_ref, wq_ref, wkv_ref, wproj_ref, bproj_ref,
                       o_ref,
                       q_scr, k_scr, v_scr, m_scr, l_scr, acc_scr, om_scr,
                       *, num_heads, head_dim, compute_dtype):
    H, hd = num_heads, head_dim
    C = H * hd
    ki = pl.program_id(2)
    nk = pl.num_programs(2)

    # ---- once per (batch, q-tile): lane-dense Q projection + head split ------
    @pl.when(ki == 0)
    def _init():
        xq = xq_ref[...].astype(compute_dtype)                       # (tq, C)
        q = jnp.dot(xq, wq_ref[...],
                    preferred_element_type=jnp.float32)              # (tq, C); scale pre-folded
        qc = q.astype(compute_dtype)
        for h in range(H):                                           # static head split
            q_scr[h] = qc[:, h * hd:(h + 1) * hd]                    # (tq, hd)
        m_scr[...] = jnp.full(m_scr.shape, -jnp.inf, dtype=m_scr.dtype)
        l_scr[...] = jnp.zeros(l_scr.shape, dtype=l_scr.dtype)
        acc_scr[...] = jnp.zeros(acc_scr.shape, dtype=acc_scr.dtype)

    # ---- every kv step: lane-dense K|V projection, one (tk,C)@(C,2C) matmul --
    xkv = xkv_ref[...].astype(compute_dtype)                         # (tk, C)
    kv = jnp.dot(xkv, wkv_ref[...],
                 preferred_element_type=jnp.float32)                 # (tk, 2C) = [k heads | v heads]
    kvc = kv.astype(compute_dtype)
    for h in range(H):
        k_scr[h] = kvc[:, h * hd:(h + 1) * hd]
        v_scr[h] = kvc[:, C + h * hd:C + (h + 1) * hd]

    # ---- head-batched scores + online (flash) softmax ------------------------
    s = jnp.einsum('hqd,hkd->hqk', q_scr[...], k_scr[...],
                   preferred_element_type=jnp.float32)               # (H, tq, tk)

    m_prev = m_scr[...]
    m_new = jnp.maximum(m_prev, jnp.max(s, axis=-1, keepdims=True))  # (H, tq, 1)
    alpha = jnp.exp(m_prev - m_new)
    p = jnp.exp(s - m_new)                                           # (H, tq, tk)
    l_scr[...] = alpha * l_scr[...] + jnp.sum(p, axis=-1, keepdims=True)
    acc_scr[...] = alpha * acc_scr[...] + jnp.einsum(
        'hqk,hkd->hqd', p.astype(compute_dtype), v_scr[...],
        preferred_element_type=jnp.float32)                          # (H, tq, hd)
    m_scr[...] = m_new

    # ---- last kv step: normalize, merge heads, dense output projection -------
    @pl.when(ki == nk - 1)
    def _finalize():
        inv_l = pl.reciprocal(l_scr[...], approx=True)               # EUP slot
        o3 = (acc_scr[...] * inv_l).astype(compute_dtype)            # (H, tq, hd)
        for h in range(H):
            om_scr[:, h * hd:(h + 1) * hd] = o3[h]                   # merge heads -> (tq, C)
        y = jnp.dot(om_scr[...], wproj_ref[...],
                    preferred_element_type=jnp.float32)              # (tq, C)
        y = y + bproj_ref[...]
        o_ref[...] = y.astype(o_ref.dtype)


def _estimate_vmem_limit_bytes(tq, tk, C, H, hd, in_dtype, compute_dtype):
    """Explicit scoped-VMEM request sized from the actual buffers (+ headroom)."""
    xb = jnp.dtype(in_dtype).itemsize
    cb = jnp.dtype(compute_dtype).itemsize
    f32 = 4
    blocks = 2 * (tq * C + tk * C + tq * C) * xb                     # dbl-buffered x_q, x_kv, out
    weights = 2 * ((C * C) + (C * 2 * C) + (C * C)) * cb + 2 * C * f32
    scratch = (H * tq * hd + 2 * H * tk * hd + tq * C) * cb \
        + (2 * H * tq + H * tq * hd) * f32
    temps = 2 * H * tq * tk * f32                                    # scores / probs live ranges
    est = blocks + weights + scratch + temps
    return int(min(max(1.5 * est, 32 * 2 ** 20), 48 * 2 ** 20))


def attention_pallas(x, w_qkv_t, w_proj_t, b_proj, *, num_heads, scale,
                     q_tile=256, kv_tile=512, compute_dtype=jnp.bfloat16):
    """x: (B, N, C); w_qkv_t: (C, 3C); w_proj_t: (C, C); b_proj: (1, C)."""
    B, N, C = x.shape
    H = num_heads
    assert C % H == 0
    hd = C // H

    tq = min(q_tile, N)
    tk = min(kv_tile, N)
    assert N % tq == 0 and N % tk == 0, "sequence length must tile evenly"
    assert tq == N or tq % 8 == 0
    assert tk == N or tk % 8 == 0
    nq, nk = N // tq, N // tk

    # One-time wrapper-side weight relayout (plain JAX, outside the kernel).
    # PyTorch qkv output feature order is [q | k | v] x [head] x [head_dim], so
    # columns [0:C] of the pre-transposed (C, 3C) weight are the Q projection
    # (head-major) and [C:3C] are K|V.  Softmax scale is folded into Q columns
    # (exact power of two for hd in {4, 16, 64}).  Weights stored bf16.
    w_qkv_t = w_qkv_t.astype(jnp.float32)
    wq = (w_qkv_t[:, :C] * scale).astype(compute_dtype)              # (C, C)
    wkv = w_qkv_t[:, C:].astype(compute_dtype)                       # (C, 2C)
    wproj = w_proj_t.astype(compute_dtype)                           # (C, C)
    bproj = b_proj.astype(jnp.float32)                               # (1, C)

    vmem_limit = _estimate_vmem_limit_bytes(tq, tk, C, H, hd, x.dtype, compute_dtype)

    kernel = functools.partial(_flash_attn_kernel, num_heads=H, head_dim=hd,
                               compute_dtype=compute_dtype)
    return pl.pallas_call(
        kernel,
        out_shape=jax.ShapeDtypeStruct((B, N, C), x.dtype),
        grid=(B, nq, nk),
        in_specs=[
            # query rows of x for this (b, qi) tile (batch dim squeezed)
            pl.BlockSpec((pl.Squeezed(), tq, C), lambda b, qi, ki: (b, qi, 0)),
            # key/value rows of x for this kv step
            pl.BlockSpec((pl.Squeezed(), tk, C), lambda b, qi, ki: (b, ki, 0)),
            # weights / bias: constant index maps -> resident across grid steps
            pl.BlockSpec((C, C), lambda b, qi, ki: (0, 0)),
            pl.BlockSpec((C, 2 * C), lambda b, qi, ki: (0, 0)),
            pl.BlockSpec((C, C), lambda b, qi, ki: (0, 0)),
            pl.BlockSpec((1, C), lambda b, qi, ki: (0, 0)),
        ],
        out_specs=pl.BlockSpec((pl.Squeezed(), tq, C), lambda b, qi, ki: (b, qi, 0)),
        scratch_shapes=[
            pltpu.VMEM((H, tq, hd), compute_dtype),   # q (head-split, persists over kv steps)
            pltpu.VMEM((H, tk, hd), compute_dtype),   # k (this kv step)
            pltpu.VMEM((H, tk, hd), compute_dtype),   # v (this kv step)
            pltpu.VMEM((H, tq, 1), jnp.float32),      # running row max
            pltpu.VMEM((H, tq, 1), jnp.float32),      # running softmax denominator
            pltpu.VMEM((H, tq, hd), jnp.float32),     # output accumulator
            pltpu.VMEM((tq, C), compute_dtype),       # merged heads (proj matmul input)
        ],
        compiler_params=pltpu.CompilerParams(
            dimension_semantics=("parallel", "parallel", "arbitrary"),
            vmem_limit_bytes=vmem_limit),
    )(x, x, wq, wkv, wproj, bproj)


def attention_reference(x, w_qkv_t, w_proj_t, b_proj, *, num_heads, scale):
    """Pure-JAX (f32) reference mirroring the PyTorch forward exactly."""
    B, N, C = x.shape
    hd = C // num_heads
    qkv = jnp.einsum('bnc,cd->bnd', x, w_qkv_t)                      # (B, N, 3C)
    qkv = qkv.reshape(B, N, 3, num_heads, hd).transpose(2, 0, 3, 1, 4)
    q, k, v = qkv[0], qkv[1], qkv[2]                                 # (B, H, N, hd)
    attn = jnp.einsum('bhqd,bhkd->bhqk', q, k) * scale
    attn = jax.nn.softmax(attn, axis=-1)
    out = jnp.einsum('bhqk,bhkd->bhqd', attn, v)                     # (B, H, N, hd)
    out = out.transpose(0, 2, 1, 3).reshape(B, N, C)
    return jnp.einsum('bnc,cd->bnd', out, w_proj_t) + b_proj[0]


if __name__ == "__main__":
    def _check(B, N, C, num_heads, q_tile, kv_tile):
        head_dim = C // num_heads
        scale = head_dim ** (-0.5)
        key = jax.random.PRNGKey(0)
        kx, kqkv, kproj, kb = jax.random.split(key, 4)
        x = jax.random.normal(kx, (B, N, C), dtype=jnp.float32)
        # nn.Linear parameters, pre-transposed to (in_features, out_features).
        w_qkv_t = 0.02 * jax.random.normal(kqkv, (C, 3 * C), dtype=jnp.float32)
        w_proj_t = 0.02 * jax.random.normal(kproj, (C, C), dtype=jnp.float32)
        b_proj = 0.01 * jax.random.normal(kb, (1, C), dtype=jnp.float32)

        out = attention_pallas(x, w_qkv_t, w_proj_t, b_proj,
                               num_heads=num_heads, scale=scale,
                               q_tile=q_tile, kv_tile=kv_tile)
        out = jax.block_until_ready(out)
        ref = attention_reference(x, w_qkv_t, w_proj_t, b_proj,
                                  num_heads=num_heads, scale=scale)
        assert out.shape == (B, N, C)
        # bf16 MXU operands + EUP approximate reciprocal -> loosened tolerance.
        assert jnp.allclose(out, ref, atol=2e-2, rtol=2e-2), (
            f"mismatch vs reference (max abs err "
            f"{float(jnp.max(jnp.abs(out - ref)))})")

    # Toy shape matching the spec's Attention module (single kv step).
    _check(B=2, N=8, C=32, num_heads=8, q_tile=256, kv_tile=512)
    # Small multi-tile shape exercising the online-softmax kv loop + q tiling.
    _check(B=1, N=128, C=128, num_heads=8, q_tile=64, kv_tile=32)

    # TODO(synk): only the core Attention forward is a Pallas kernel; the rest
    # of NLOSUpsamplingViT (Zipper MLPs, argsort/gather token unshuffle,
    # LayerNorm/MLP/residuals of the 24 Blocks) stays in plain JAX.
    print("KERNEL_OK")
</pallas_src>

<mosaic_0001>
module attributes {stable_mosaic.version = 11 : i64} {
  func.func @_flash_attn_kernel(%arg0: i32, %arg1: i32, %arg2: i32, %arg3: memref<1x8x32xf32, #tpu.memory_space<vmem>>, %arg4: memref<1x8x32xf32, #tpu.memory_space<vmem>>, %arg5: memref<32x32xbf16, #tpu.memory_space<vmem>>, %arg6: memref<32x64xbf16, #tpu.memory_space<vmem>>, %arg7: memref<32x32xbf16, #tpu.memory_space<vmem>>, %arg8: memref<1x32xf32, #tpu.memory_space<vmem>>, %arg9: memref<1x8x32xf32, #tpu.memory_space<vmem>>, %arg10: memref<8x8x4xbf16, #tpu.memory_space<vmem>>, %arg11: memref<8x8x4xbf16, #tpu.memory_space<vmem>>, %arg12: memref<8x8x4xbf16, #tpu.memory_space<vmem>>, %arg13: memref<8x8x1xf32, #tpu.memory_space<vmem>>, %arg14: memref<8x8x1xf32, #tpu.memory_space<vmem>>, %arg15: memref<8x8x4xf32, #tpu.memory_space<vmem>>, %arg16: memref<8x32xbf16, #tpu.memory_space<vmem>>) attributes {dimension_semantics = [#tpu.dimension_semantics<parallel>, #tpu.dimension_semantics<parallel>, #tpu.dimension_semantics<arbitrary>], iteration_bounds = array<i64: 2, 1, 1>, scalar_prefetch = 0 : i64, scratch_operands = 7 : i64, tpu.core_type = #tpu.core_type<tc>, window_params = [{transform_indices = @transform_0, window_bounds = array<i64: 1, 8, 32>}, {transform_indices = @transform_1, window_bounds = array<i64: 1, 8, 32>}, {pipeline_mode = #tpu.pipeline_mode<synchronous>, transform_indices = @transform_2, window_bounds = array<i64: 32, 32>}, {pipeline_mode = #tpu.pipeline_mode<synchronous>, transform_indices = @transform_3, window_bounds = array<i64: 32, 64>}, {pipeline_mode = #tpu.pipeline_mode<synchronous>, transform_indices = @transform_4, window_bounds = array<i64: 32, 32>}, {pipeline_mode = #tpu.pipeline_mode<synchronous>, transform_indices = @transform_5, window_bounds = array<i64: 1, 32>}, {transform_indices = @transform_6, window_bounds = array<i64: 1, 8, 32>}]} {
    %c0_i32 = arith.constant 0 : i32
    %0 = arith.cmpi eq, %arg2, %c0_i32 : i32
    %1 = arith.extui %0 : i1 to i32
    %c0_i32_0 = arith.constant 0 : i32
    %2 = arith.cmpi ne, %1, %c0_i32_0 : i32
    scf.if %2 {
      %c0_79 = arith.constant 0 : index
      %c0_80 = arith.constant 0 : index
      %c0_81 = arith.constant 0 : index
      %103 = vector.load %arg3[%c0_79, %c0_80, %c0_81] : memref<1x8x32xf32, #tpu.memory_space<vmem>>, vector<1x8x32xf32>
      %104 = vector.shape_cast %103 : vector<1x8x32xf32> to vector<8x32xf32>
      %105 = arith.truncf %104 : vector<8x32xf32> to vector<8x32xbf16>
      %c0_82 = arith.constant 0 : index
      %c0_83 = arith.constant 0 : index
      %106 = vector.load %arg5[%c0_82, %c0_83] : memref<32x32xbf16, #tpu.memory_space<vmem>>, vector<32x32xbf16>
      %cst_84 = arith.constant dense<0.000000e+00> : vector<8x32xf32>
      %107 = tpu.matmul %105, %106, %cst_84 {dimension_numbers = #tpu.dot_dimension_numbers<[1], [0], [0], [1], [0, 0, 1, 1], [], []>} : vector<8x32xbf16>, vector<32x32xbf16>, vector<8x32xf32> -> vector<8x32xf32>
      %108 = arith.truncf %107 : vector<8x32xf32> to vector<8x32xbf16>
      %109 = vector.extract_strided_slice %108 {offsets = [0, 0], sizes = [8, 4], strides = [1, 1]} : vector<8x32xbf16> to vector<8x4xbf16>
      %c0_85 = arith.constant 0 : index
      %c0_86 = arith.constant 0 : index
      %c0_87 = arith.constant 0 : index
      %110 = vector.load %arg10[%c0_85, %c0_86, %c0_87] : memref<8x8x4xbf16, #tpu.memory_space<vmem>>, vector<1x8x4xbf16>
      %111 = vector.shape_cast %110 : vector<1x8x4xbf16> to vector<8x4xbf16>
      %112 = vector.shape_cast %109 : vector<8x4xbf16> to vector<1x8x4xbf16>
      tpu.vector_store %arg10[%c0_85, %c0_86, %c0_87], %112 {strides = array<i32>} : memref<8x8x4xbf16, #tpu.memory_space<vmem>>, vector<1x8x4xbf16>,
      %113 = vector.extract_strided_slice %108 {offsets = [0, 4], sizes = [8, 4], strides = [1, 1]} : vector<8x32xbf16> to vector<8x4xbf16>
      %c1_88 = arith.constant 1 : index
      %c0_89 = arith.constant 0 : index
      %c0_90 = arith.constant 0 : index
      %114 = vector.load %arg10[%c1_88, %c0_89, %c0_90] : memref<8x8x4xbf16, #tpu.memory_space<vmem>>, vector<1x8x4xbf16>
      %115 = vector.shape_cast %114 : vector<1x8x4xbf16> to vector<8x4xbf16>
      %116 = vector.shape_cast %113 : vector<8x4xbf16> to vector<1x8x4xbf16>
      tpu.vector_store %arg10[%c1_88, %c0_89, %c0_90], %116 {strides = array<i32>} : memref<8x8x4xbf16, #tpu.memory_space<vmem>>, vector<1x8x4xbf16>,
      %117 = vector.extract_strided_slice %108 {offsets = [0, 8], sizes = [8, 4], strides = [1, 1]} : vector<8x32xbf16> to vector<8x4xbf16>
      %c2_91 = arith.constant 2 : index
      %c0_92 = arith.constant 0 : index
      %c0_93 = arith.constant 0 : index
      %118 = vector.load %arg10[%c2_91, %c0_92, %c0_93] : memref<8x8x4xbf16, #tpu.memory_space<vmem>>, vector<1x8x4xbf16>
      %119 = vector.shape_cast %118 : vector<1x8x4xbf16> to vector<8x4xbf16>
      %120 = vector.shape_cast %117 : vector<8x4xbf16> to vector<1x8x4xbf16>
      tpu.vector_store %arg10[%c2_91, %c0_92, %c0_93], %120 {strides = array<i32>} : memref<8x8x4xbf16, #tpu.memory_space<vmem>>, vector<1x8x4xbf16>,
      %121 = vector.extract_strided_slice %108 {offsets = [0, 12], sizes = [8, 4], strides = [1, 1]} : vector<8x32xbf16> to vector<8x4xbf16>
      %c3_94 = arith.constant 3 : index
      %c0_95 = arith.constant 0 : index
      %c0_96 = arith.constant 0 : index
      %122 = vector.load %arg10[%c3_94, %c0_95, %c0_96] : memref<8x8x4xbf16, #tpu.memory_space<vmem>>, vector<1x8x4xbf16>
      %123 = vector.shape_cast %122 : vector<1x8x4xbf16> to vector<8x4xbf16>
      %124 = vector.shape_cast %121 : vector<8x4xbf16> to vector<1x8x4xbf16>
      tpu.vector_store %arg10[%c3_94, %c0_95, %c0_96], %124 {strides = array<i32>} : memref<8x8x4xbf16, #tpu.memory_space<vmem>>, vector<1x8x4xbf16>,
      %125 = vector.extract_strided_slice %108 {offsets = [0, 16], sizes = [8, 4], strides = [1, 1]} : vector<8x32xbf16> to vector<8x4xbf16>
      %c4_97 = arith.constant 4 : index
      %c0_98 = arith.constant 0 : index
      %c0_99 = arith.constant 0 : index
      %126 = vector.load %arg10[%c4_97, %c0_98, %c0_99] : memref<8x8x4xbf16, #tpu.memory_space<vmem>>, vector<1x8x4xbf16>
      %127 = vector.shape_cast %126 : vector<1x8x4xbf16> to vector<8x4xbf16>
      %128 = vector.shape_cast %125 : vector<8x4xbf16> to vector<1x8x4xbf16>
      tpu.vector_store %arg10[%c4_97, %c0_98, %c0_99], %128 {strides = array<i32>} : memref<8x8x4xbf16, #tpu.memory_space<vmem>>, vector<1x8x4xbf16>,
      %129 = vector.extract_strided_slice %108 {offsets = [0, 20], sizes = [8, 4], strides = [1, 1]} : vector<8x32xbf16> to vector<8x4xbf16>
      %c5_100 = arith.constant 5 : index
      %c0_101 = arith.constant 0 : index
      %c0_102 = arith.constant 0 : index
      %130 = vector.load %arg10[%c5_100, %c0_101, %c0_102] : memref<8x8x4xbf16, #tpu.memory_space<vmem>>, vector<1x8x4xbf16>
      %131 = vector.shape_cast %130 : vector<1x8x4xbf16> to vector<8x4xbf16>
      %132 = vector.shape_cast %129 : vector<8x4xbf16> to vector<1x8x4xbf16>
      tpu.vector_store %arg10[%c5_100, %c0_101, %c0_102], %132 {strides = array<i32>} : memref<8x8x4xbf16, #tpu.memory_space<vmem>>, vector<1x8x4xbf16>,
      %133 = vector.extract_strided_slice %108 {offsets = [0, 24], sizes = [8, 4], strides = [1, 1]} : vector<8x32xbf16> to vector<8x4xbf16>
      %c6_103 = arith.constant 6 : index
      %c0_104 = arith.constant 0 : index
      %c0_105 = arith.constant 0 : index
      %134 = vector.load %arg10[%c6_103, %c0_104, %c0_105] : memref<8x8x4xbf16, #tpu.memory_space<vmem>>, vector<1x8x4xbf16>
      %135 = vector.shape_cast %134 : vector<1x8x4xbf16> to vector<8x4xbf16>
      %136 = vector.shape_cast %133 : vector<8x4xbf16> to vector<1x8x4xbf16>
      tpu.vector_store %arg10[%c6_103, %c0_104, %c0_105], %136 {strides = array<i32>} : memref<8x8x4xbf16, #tpu.memory_space<vmem>>, vector<1x8x4xbf16>,
      %137 = vector.extract_strided_slice %108 {offsets = [0, 28], sizes = [8, 4], strides = [1, 1]} : vector<8x32xbf16> to vector<8x4xbf16>
      %c7_106 = arith.constant 7 : index
      %c0_107 = arith.constant 0 : index
      %c0_108 = arith.constant 0 : index
      %138 = vector.load %arg10[%c7_106, %c0_107, %c0_108] : memref<8x8x4xbf16, #tpu.memory_space<vmem>>, vector<1x8x4xbf16>
      %139 = vector.shape_cast %138 : vector<1x8x4xbf16> to vector<8x4xbf16>
      %140 = vector.shape_cast %137 : vector<8x4xbf16> to vector<1x8x4xbf16>
      tpu.vector_store %arg10[%c7_106, %c0_107, %c0_108], %140 {strides = array<i32>} : memref<8x8x4xbf16, #tpu.memory_space<vmem>>, vector<1x8x4xbf16>,
      %cst_109 = arith.constant 0xFF800000 : f32
      %141 = vector.broadcast %cst_109 : f32 to vector<8x8x1xf32>
      %c0_110 = arith.constant 0 : index
      %c0_111 = arith.constant 0 : index
      %c0_112 = arith.constant 0 : index
      %142 = vector.load %arg13[%c0_110, %c0_111, %c0_112] : memref<8x8x1xf32, #tpu.memory_space<vmem>>, vector<8x8x1xf32>
      tpu.vector_store %arg13[%c0_110, %c0_111, %c0_112], %141 {strides = array<i32>} : memref<8x8x1xf32, #tpu.memory_space<vmem>>, vector<8x8x1xf32>,
      %cst_113 = arith.constant 0.000000e+00 : f32
      %143 = vector.broadcast %cst_113 : f32 to vector<8x8x1xf32>
      %c0_114 = arith.constant 0 : index
      %c0_115 = arith.constant 0 : index
      %c0_116 = arith.constant 0 : index
      %144 = vector.load %arg14[%c0_114, %c0_115, %c0_116] : memref<8x8x1xf32, #tpu.memory_space<vmem>>, vector<8x8x1xf32>
      tpu.vector_store %arg14[%c0_114, %c0_115, %c0_116], %143 {strides = array<i32>} : memref<8x8x1xf32, #tpu.memory_space<vmem>>, vector<8x8x1xf32>,
      %cst_117 = arith.constant 0.000000e+00 : f32
      %145 = vector.broadcast %cst_117 : f32 to vector<8x8x4xf32>
      %c0_118 = arith.constant 0 : index
      %c0_119 = arith.constant 0 : index
      %c0_120 = arith.constant 0 : index
      %146 = vector.load %arg15[%c0_118, %c0_119, %c0_120] : memref<8x8x4xf32, #tpu.memory_space<vmem>>, vector<8x8x4xf32>
      tpu.vector_store %arg15[%c0_118, %c0_119, %c0_120], %145 {strides = array<i32>} : memref<8x8x4xf32, #tpu.memory_space<vmem>>, vector<8x8x4xf32>,
    } else {
    }
    %c0 = arith.constant 0 : index
    %c0_1 = arith.constant 0 : index
    %c0_2 = arith.constant 0 : index
    %3 = vector.load %arg4[%c0, %c0_1, %c0_2] : memref<1x8x32xf32, #tpu.memory_space<vmem>>, vector<1x8x32xf32>
    %4 = vector.shape_cast %3 : vector<1x8x32xf32> to vector<8x32xf32>
    %5 = arith.truncf %4 : vector<8x32xf32> to vector<8x32xbf16>
    %c0_3 = arith.constant 0 : index
    %c0_4 = arith.constant 0 : index
    %6 = vector.load %arg6[%c0_3, %c0_4] : memref<32x64xbf16, #tpu.memory_space<vmem>>, vector<32x64xbf16>
    %cst = arith.constant dense<0.000000e+00> : vector<8x64xf32>
    %7 = tpu.matmul %5, %6, %cst {dimension_numbers = #tpu.dot_dimension_numbers<[1], [0], [0], [1], [0, 0, 1, 1], [], []>} : vector<8x32xbf16>, vector<32x64xbf16>, vector<8x64xf32> -> vector<8x64xf32>
    %8 = arith.truncf %7 : vector<8x64xf32> to vector<8x64xbf16>
    %9 = vector.extract_strided_slice %8 {offsets = [0, 0], sizes = [8, 4], strides = [1, 1]} : vector<8x64xbf16> to vector<8x4xbf16>
    %c0_5 = arith.constant 0 : index
    %c0_6 = arith.constant 0 : index
    %c0_7 = arith.constant 0 : index
    %10 = vector.load %arg11[%c0_5, %c0_6, %c0_7] : memref<8x8x4xbf16, #tpu.memory_space<vmem>>, vector<1x8x4xbf16>
    %11 = vector.shape_cast %10 : vector<1x8x4xbf16> to vector<8x4xbf16>
    %12 = vector.shape_cast %9 : vector<8x4xbf16> to vector<1x8x4xbf16>
    tpu.vector_store %arg11[%c0_5, %c0_6, %c0_7], %12 {strides = array<i32>} : memref<8x8x4xbf16, #tpu.memory_space<vmem>>, vector<1x8x4xbf16>,
    %13 = vector.extract_strided_slice %8 {offsets = [0, 32], sizes = [8, 4], strides = [1, 1]} : vector<8x64xbf16> to vector<8x4xbf16>
    %c0_8 = arith.constant 0 : index
    %c0_9 = arith.constant 0 : index
    %c0_10 = arith.constant 0 : index
    %14 = vector.load %arg12[%c0_8, %c0_9, %c0_10] : memref<8x8x4xbf16, #tpu.memory_space<vmem>>, vector<1x8x4xbf16>
    %15 = vector.shape_cast %14 : vector<1x8x4xbf16> to vector<8x4xbf16>
    %16 = vector.shape_cast %13 : vector<8x4xbf16> to vector<1x8x4xbf16>
    tpu.vector_store %arg12[%c0_8, %c0_9, %c0_10], %16 {strides = array<i32>} : memref<8x8x4xbf16, #tpu.memory_space<vmem>>, vector<1x8x4xbf16>,
    %17 = vector.extract_strided_slice %8 {offsets = [0, 4], sizes = [8, 4], strides = [1, 1]} : vector<8x64xbf16> to vector<8x4xbf16>
    %c1 = arith.constant 1 : index
    %c0_11 = arith.constant 0 : index
    %c0_12 = arith.constant 0 : index
    %18 = vector.load %arg11[%c1, %c0_11, %c0_12] : memref<8x8x4xbf16, #tpu.memory_space<vmem>>, vector<1x8x4xbf16>
    %19 = vector.shape_cast %18 : vector<1x8x4xbf16> to vector<8x4xbf16>
    %20 = vector.shape_cast %17 : vector<8x4xbf16> to vector<1x8x4xbf16>
    tpu.vector_store %arg11[%c1, %c0_11, %c0_12], %20 {strides = array<i32>} : memref<8x8x4xbf16, #tpu.memory_space<vmem>>, vector<1x8x4xbf16>,
    %21 = vector.extract_strided_slice %8 {offsets = [0, 36], sizes = [8, 4], strides = [1, 1]} : vector<8x64xbf16> to vector<8x4xbf16>
    %c1_13 = arith.constant 1 : index
    %c0_14 = arith.constant 0 : index
    %c0_15 = arith.constant 0 : index
    %22 = vector.load %arg12[%c1_13, %c0_14, %c0_15] : memref<8x8x4xbf16, #tpu.memory_space<vmem>>, vector<1x8x4xbf16>
    %23 = vector.shape_cast %22 : vector<1x8x4xbf16> to vector<8x4xbf16>
    %24 = vector.shape_cast %21 : vector<8x4xbf16> to vector<1x8x4xbf16>
    tpu.vector_store %arg12[%c1_13, %c0_14, %c0_15], %24 {strides = array<i32>} : memref<8x8x4xbf16, #tpu.memory_space<vmem>>, vector<1x8x4xbf16>,
    %25 = vector.extract_strided_slice %8 {offsets = [0, 8], sizes = [8, 4], strides = [1, 1]} : vector<8x64xbf16> to vector<8x4xbf16>
    %c2 = arith.constant 2 : index
    %c0_16 = arith.constant 0 : index
    %c0_17 = arith.constant 0 : index
    %26 = vector.load %arg11[%c2, %c0_16, %c0_17] : memref<8x8x4xbf16, #tpu.memory_space<vmem>>, vector<1x8x4xbf16>
    %27 = vector.shape_cast %26 : vector<1x8x4xbf16> to vector<8x4xbf16>
    %28 = vector.shape_cast %25 : vector<8x4xbf16> to vector<1x8x4xbf16>
    tpu.vector_store %arg11[%c2, %c0_16, %c0_17], %28 {strides = array<i32>} : memref<8x8x4xbf16, #tpu.memory_space<vmem>>, vector<1x8x4xbf16>,
    %29 = vector.extract_strided_slice %8 {offsets = [0, 40], sizes = [8, 4], strides = [1, 1]} : vector<8x64xbf16> to vector<8x4xbf16>
    %c2_18 = arith.constant 2 : index
    %c0_19 = arith.constant 0 : index
    %c0_20 = arith.constant 0 : index
    %30 = vector.load %arg12[%c2_18, %c0_19, %c0_20] : memref<8x8x4xbf16, #tpu.memory_space<vmem>>, vector<1x8x4xbf16>
    %31 = vector.shape_cast %30 : vector<1x8x4xbf16> to vector<8x4xbf16>
    %32 = vector.shape_cast %29 : vector<8x4xbf16> to vector<1x8x4xbf16>
    tpu.vector_store %arg12[%c2_18, %c0_19, %c0_20], %32 {strides = array<i32>} : memref<8x8x4xbf16, #tpu.memory_space<vmem>>, vector<1x8x4xbf16>,
    %33 = vector.extract_strided_slice %8 {offsets = [0, 12], sizes = [8, 4], strides = [1, 1]} : vector<8x64xbf16> to vector<8x4xbf16>
    %c3 = arith.constant 3 : index
    %c0_21 = arith.constant 0 : index
    %c0_22 = arith.constant 0 : index
    %34 = vector.load %arg11[%c3, %c0_21, %c0_22] : memref<8x8x4xbf16, #tpu.memory_space<vmem>>, vector<1x8x4xbf16>
    %35 = vector.shape_cast %34 : vector<1x8x4xbf16> to vector<8x4xbf16>
    %36 = vector.shape_cast %33 : vector<8x4xbf16> to vector<1x8x4xbf16>
    tpu.vector_store %arg11[%c3, %c0_21, %c0_22], %36 {strides = array<i32>} : memref<8x8x4xbf16, #tpu.memory_space<vmem>>, vector<1x8x4xbf16>,
    %37 = vector.extract_strided_slice %8 {offsets = [0, 44], sizes = [8, 4], strides = [1, 1]} : vector<8x64xbf16> to vector<8x4xbf16>
    %c3_23 = arith.constant 3 : index
    %c0_24 = arith.constant 0 : index
    %c0_25 = arith.constant 0 : index
    %38 = vector.load %arg12[%c3_23, %c0_24, %c0_25] : memref<8x8x4xbf16, #tpu.memory_space<vmem>>, vector<1x8x4xbf16>
    %39 = vector.shape_cast %38 : vector<1x8x4xbf16> to vector<8x4xbf16>
    %40 = vector.shape_cast %37 : vector<8x4xbf16> to vector<1x8x4xbf16>
    tpu.vector_store %arg12[%c3_23, %c0_24, %c0_25], %40 {strides = array<i32>} : memref<8x8x4xbf16, #tpu.memory_space<vmem>>, vector<1x8x4xbf16>,
    %41 = vector.extract_strided_slice %8 {offsets = [0, 16], sizes = [8, 4], strides = [1, 1]} : vector<8x64xbf16> to vector<8x4xbf16>
    %c4 = arith.constant 4 : index
    %c0_26 = arith.constant 0 : index
    %c0_27 = arith.constant 0 : index
    %42 = vector.load %arg11[%c4, %c0_26, %c0_27] : memref<8x8x4xbf16, #tpu.memory_space<vmem>>, vector<1x8x4xbf16>
    %43 = vector.shape_cast %42 : vector<1x8x4xbf16> to vector<8x4xbf16>
    %44 = vector.shape_cast %41 : vector<8x4xbf16> to vector<1x8x4xbf16>
    tpu.vector_store %arg11[%c4, %c0_26, %c0_27], %44 {strides = array<i32>} : memref<8x8x4xbf16, #tpu.memory_space<vmem>>, vector<1x8x4xbf16>,
    %45 = vector.extract_strided_slice %8 {offsets = [0, 48], sizes = [8, 4], strides = [1, 1]} : vector<8x64xbf16> to vector<8x4xbf16>
    %c4_28 = arith.constant 4 : index
    %c0_29 = arith.constant 0 : index
    %c0_30 = arith.constant 0 : index
    %46 = vector.load %arg12[%c4_28, %c0_29, %c0_30] : memref<8x8x4xbf16, #tpu.memory_space<vmem>>, vector<1x8x4xbf16>
    %47 = vector.shape_cast %46 : vector<1x8x4xbf16> to vector<8x4xbf16>
    %48 = vector.shape_cast %45 : vector<8x4xbf16> to vector<1x8x4xbf16>
    tpu.vector_store %arg12[%c4_28, %c0_29, %c0_30], %48 {strides = array<i32>} : memref<8x8x4xbf16, #tpu.memory_space<vmem>>, vector<1x8x4xbf16>,
    %49 = vector.extract_strided_slice %8 {offsets = [0, 20], sizes = [8, 4], strides = [1, 1]} : vector<8x64xbf16> to vector<8x4xbf16>
    %c5 = arith.constant 5 : index
    %c0_31 = arith.constant 0 : index
    %c0_32 = arith.constant 0 : index
    %50 = vector.load %arg11[%c5, %c0_31, %c0_32] : memref<8x8x4xbf16, #tpu.memory_space<vmem>>, vector<1x8x4xbf16>
    %51 = vector.shape_cast %50 : vector<1x8x4xbf16> to vector<8x4xbf16>
    %52 = vector.shape_cast %49 : vector<8x4xbf16> to vector<1x8x4xbf16>
    tpu.vector_store %arg11[%c5, %c0_31, %c0_32], %52 {strides = array<i32>} : memref<8x8x4xbf16, #tpu.memory_space<vmem>>, vector<1x8x4xbf16>,
    %53 = vector.extract_strided_slice %8 {offsets = [0, 52], sizes = [8, 4], strides = [1, 1]} : vector<8x64xbf16> to vector<8x4xbf16>
    %c5_33 = arith.constant 5 : index
    %c0_34 = arith.constant 0 : index
    %c0_35 = arith.constant 0 : index
    %54 = vector.load %arg12[%c5_33, %c0_34, %c0_35] : memref<8x8x4xbf16, #tpu.memory_space<vmem>>, vector<1x8x4xbf16>
    %55 = vector.shape_cast %54 : vector<1x8x4xbf16> to vector<8x4xbf16>
    %56 = vector.shape_cast %53 : vector<8x4xbf16> to vector<1x8x4xbf16>
    tpu.vector_store %arg12[%c5_33, %c0_34, %c0_35], %56 {strides = array<i32>} : memref<8x8x4xbf16, #tpu.memory_space<vmem>>, vector<1x8x4xbf16>,
    %57 = vector.extract_strided_slice %8 {offsets = [0, 24], sizes = [8, 4], strides = [1, 1]} : vector<8x64xbf16> to vector<8x4xbf16>
    %c6 = arith.constant 6 : index
    %c0_36 = arith.constant 0 : index
    %c0_37 = arith.constant 0 : index
    %58 = vector.load %arg11[%c6, %c0_36, %c0_37] : memref<8x8x4xbf16, #tpu.memory_space<vmem>>, vector<1x8x4xbf16>
    %59 = vector.shape_cast %58 : vector<1x8x4xbf16> to vector<8x4xbf16>
    %60 = vector.shape_cast %57 : vector<8x4xbf16> to vector<1x8x4xbf16>
    tpu.vector_store %arg11[%c6, %c0_36, %c0_37], %60 {strides = array<i32>} : memref<8x8x4xbf16, #tpu.memory_space<vmem>>, vector<1x8x4xbf16>,
    %61 = vector.extract_strided_slice %8 {offsets = [0, 56], sizes = [8, 4], strides = [1, 1]} : vector<8x64xbf16> to vector<8x4xbf16>
    %c6_38 = arith.constant 6 : index
    %c0_39 = arith.constant 0 : index
    %c0_40 = arith.constant 0 : index
    %62 = vector.load %arg12[%c6_38, %c0_39, %c0_40] : memref<8x8x4xbf16, #tpu.memory_space<vmem>>, vector<1x8x4xbf16>
    %63 = vector.shape_cast %62 : vector<1x8x4xbf16> to vector<8x4xbf16>
    %64 = vector.shape_cast %61 : vector<8x4xbf16> to vector<1x8x4xbf16>
    tpu.vector_store %arg12[%c6_38, %c0_39, %c0_40], %64 {strides = array<i32>} : memref<8x8x4xbf16, #tpu.memory_space<vmem>>, vector<1x8x4xbf16>,
    %65 = vector.extract_strided_slice %8 {offsets = [0, 28], sizes = [8, 4], strides = [1, 1]} : vector<8x64xbf16> to vector<8x4xbf16>
    %c7 = arith.constant 7 : index
    %c0_41 = arith.constant 0 : index
    %c0_42 = arith.constant 0 : index
    %66 = vector.load %arg11[%c7, %c0_41, %c0_42] : memref<8x8x4xbf16, #tpu.memory_space<vmem>>, vector<1x8x4xbf16>
    %67 = vector.shape_cast %66 : vector<1x8x4xbf16> to vector<8x4xbf16>
    %68 = vector.shape_cast %65 : vector<8x4xbf16> to vector<1x8x4xbf16>
    tpu.vector_store %arg11[%c7, %c0_41, %c0_42], %68 {strides = array<i32>} : memref<8x8x4xbf16, #tpu.memory_space<vmem>>, vector<1x8x4xbf16>,
    %69 = vector.extract_strided_slice %8 {offsets = [0, 60], sizes = [8, 4], strides = [1, 1]} : vector<8x64xbf16> to vector<8x4xbf16>
    %c7_43 = arith.constant 7 : index
    %c0_44 = arith.constant 0 : index
    %c0_45 = arith.constant 0 : index
    %70 = vector.load %arg12[%c7_43, %c0_44, %c0_45] : memref<8x8x4xbf16, #tpu.memory_space<vmem>>, vector<1x8x4xbf16>
    %71 = vector.shape_cast %70 : vector<1x8x4xbf16> to vector<8x4xbf16>
    %72 = vector.shape_cast %69 : vector<8x4xbf16> to vector<1x8x4xbf16>
    tpu.vector_store %arg12[%c7_43, %c0_44, %c0_45], %72 {strides = array<i32>} : memref<8x8x4xbf16, #tpu.memory_space<vmem>>, vector<1x8x4xbf16>,
    %c0_46 = arith.constant 0 : index
    %c0_47 = arith.constant 0 : index
    %c0_48 = arith.constant 0 : index
    %73 = vector.load %arg10[%c0_46, %c0_47, %c0_48] : memref<8x8x4xbf16, #tpu.memory_space<vmem>>, vector<8x8x4xbf16>
    %c0_49 = arith.constant 0 : index
    %c0_50 = arith.constant 0 : index
    %c0_51 = arith.constant 0 : index
    %74 = vector.load %arg11[%c0_49, %c0_50, %c0_51] : memref<8x8x4xbf16, #tpu.memory_space<vmem>>, vector<8x8x4xbf16>
    "tpu.trace_start"() <{level = 10 : i32, message = "hqd,hkd->hqk"}> : () -> ()
    %cst_52 = arith.constant dense<0.000000e+00> : vector<8x8x8xf32>
    %75 = tpu.matmul %73, %74, %cst_52 {dimension_numbers = #tpu.dot_dimension_numbers<[2], [2], [1], [1], [0, 0, 0, 1, 1, 1], [0], [0]>} : vector<8x8x4xbf16>, vector<8x8x4xbf16>, vector<8x8x8xf32> -> vector<8x8x8xf32>
    "tpu.trace_stop"() : () -> ()
    %c0_53 = arith.constant 0 : index
    %c0_54 = arith.constant 0 : index
    %c0_55 = arith.constant 0 : index
    %76 = vector.load %arg13[%c0_53, %c0_54, %c0_55] : memref<8x8x1xf32, #tpu.memory_space<vmem>>, vector<8x8x1xf32>
    %cst_56 = arith.constant dense<0xFF800000> : vector<8x8xf32>
    %77 = vector.multi_reduction <maximumf>, %75, %cst_56 [2] : vector<8x8x8xf32> to vector<8x8xf32>
    %78 = vector.shape_cast %77 : vector<8x8xf32> to vector<8x8x1xf32>
    %79 = arith.maximumf %76, %78 : vector<8x8x1xf32>
    %80 = arith.subf %76, %79 : vector<8x8x1xf32>
    %81 = math.exp %80 : vector<8x8x1xf32>
    %82 = vector.broadcast %79 : vector<8x8x1xf32> to vector<8x8x8xf32>
    %83 = arith.subf %75, %82 : vector<8x8x8xf32>
    %84 = math.exp %83 : vector<8x8x8xf32>
    %c0_57 = arith.constant 0 : index
    %c0_58 = arith.constant 0 : index
    %c0_59 = arith.constant 0 : index
    %85 = vector.load %arg14[%c0_57, %c0_58, %c0_59] : memref<8x8x1xf32, #tpu.memory_space<vmem>>, vector<8x8x1xf32>
    %86 = arith.mulf %81, %85 : vector<8x8x1xf32>
    %cst_60 = arith.constant dense<0.000000e+00> : vector<8x8xf32>
    %87 = vector.multi_reduction <add>, %84, %cst_60 [2] : vector<8x8x8xf32> to vector<8x8xf32>
    %88 = vector.shape_cast %87 : vector<8x8xf32> to vector<8x8x1xf32>
    %89 = arith.addf %86, %88 : vector<8x8x1xf32>
    %c0_61 = arith.constant 0 : index
    %c0_62 = arith.constant 0 : index
    %c0_63 = arith.constant 0 : index
    %90 = vector.load %arg14[%c0_61, %c0_62, %c0_63] : memref<8x8x1xf32, #tpu.memory_space<vmem>>, vector<8x8x1xf32>
    tpu.vector_store %arg14[%c0_61, %c0_62, %c0_63], %89 {strides = array<i32>} : memref<8x8x1xf32, #tpu.memory_space<vmem>>, vector<8x8x1xf32>,
    %c0_64 = arith.constant 0 : index
    %c0_65 = arith.constant 0 : index
    %c0_66 = arith.constant 0 : index
    %91 = vector.load %arg15[%c0_64, %c0_65, %c0_66] : memref<8x8x4xf32, #tpu.memory_space<vmem>>, vector<8x8x4xf32>
    %92 = vector.broadcast %81 : vector<8x8x1xf32> to vector<8x8x4xf32>
    %93 = arith.mulf %92, %91 : vector<8x8x4xf32>
    %94 = arith.truncf %84 : vector<8x8x8xf32> to vector<8x8x8xbf16>
    %c0_67 = arith.constant 0 : index
    %c0_68 = arith.constant 0 : index
    %c0_69 = arith.constant 0 : index
    %95 = vector.load %arg12[%c0_67, %c0_68, %c0_69] : memref<8x8x4xbf16, #tpu.memory_space<vmem>>, vector<8x8x4xbf16>
    "tpu.trace_start"() <{level = 10 : i32, message = "hqk,hkd->hqd"}> : () -> ()
    %cst_70 = arith.constant dense<0.000000e+00> : vector<8x8x4xf32>
    %96 = tpu.matmul %94, %95, %cst_70 {dimension_numbers = #tpu.dot_dimension_numbers<[2], [1], [1], [2], [0, 0, 0, 1, 1, 2], [0], [0]>} : vector<8x8x8xbf16>, vector<8x8x4xbf16>, vector<8x8x4xf32> -> vector<8x8x4xf32>
    "tpu.trace_stop"() : () -> ()
    %97 = arith.addf %93, %96 : vector<8x8x4xf32>
    %c0_71 = arith.constant 0 : index
    %c0_72 = arith.constant 0 : index
    %c0_73 = arith.constant 0 : index
    %98 = vector.load %arg15[%c0_71, %c0_72, %c0_73] : memref<8x8x4xf32, #tpu.memory_space<vmem>>, vector<8x8x4xf32>
    tpu.vector_store %arg15[%c0_71, %c0_72, %c0_73], %97 {strides = array<i32>} : memref<8x8x4xf32, #tpu.memory_space<vmem>>, vector<8x8x4xf32>,
    %c0_74 = arith.constant 0 : index
    %c0_75 = arith.constant 0 : index
    %c0_76 = arith.constant 0 : index
    %99 = vector.load %arg13[%c0_74, %c0_75, %c0_76] : memref<8x8x1xf32, #tpu.memory_space<vmem>>, vector<8x8x1xf32>
    tpu.vector_store %arg13[%c0_74, %c0_75, %c0_76], %79 {strides = array<i32>} : memref<8x8x1xf32, #tpu.memory_space<vmem>>, vector<8x8x1xf32>,
    %c0_i32_77 = arith.constant 0 : i32
    %100 = arith.cmpi eq, %arg2, %c0_i32_77 : i32
    %101 = arith.extui %100 : i1 to i32
    %c0_i32_78 = arith.constant 0 : i32
    %102 = arith.cmpi ne, %101, %c0_i32_78 : i32
    scf.if %102 {
      %c0_79 = arith.constant 0 : index
      %c0_80 = arith.constant 0 : index
      %c0_81 = arith.constant 0 : index
      %103 = vector.load %arg14[%c0_79, %c0_80, %c0_81] : memref<8x8x1xf32, #tpu.memory_space<vmem>>, vector<8x8x1xf32>
      %104 = tpu.reciprocal %103 {approx = true} : vector<8x8x1xf32> -> vector<8x8x1xf32>
      %c0_82 = arith.constant 0 : index
      %c0_83 = arith.constant 0 : index
      %c0_84 = arith.constant 0 : index
      %105 = vector.load %arg15[%c0_82, %c0_83, %c0_84] : memref<8x8x4xf32, #tpu.memory_space<vmem>>, vector<8x8x4xf32>
      %106 = vector.broadcast %104 : vector<8x8x1xf32> to vector<8x8x4xf32>
      %107 = arith.mulf %105, %106 : vector<8x8x4xf32>
      %108 = arith.truncf %107 : vector<8x8x4xf32> to vector<8x8x4xbf16>
      %109 = vector.extract_strided_slice %108 {offsets = [0, 0, 0], sizes = [1, 8, 4], strides = [1, 1, 1]} : vector<8x8x4xbf16> to vector<1x8x4xbf16>
      %110 = vector.shape_cast %109 : vector<1x8x4xbf16> to vector<8x4xbf16>
      %c0_85 = arith.constant 0 : index
      %c0_86 = arith.constant 0 : index
      %111 = vector.load %arg16[%c0_85, %c0_86] : memref<8x32xbf16, #tpu.memory_space<vmem>>, vector<8x4xbf16>
      tpu.vector_store %arg16[%c0_85, %c0_86], %110 {strides = array<i32>} : memref<8x32xbf16, #tpu.memory_space<vmem>>, vector<8x4xbf16>,
      %112 = vector.extract_strided_slice %108 {offsets = [1, 0, 0], sizes = [1, 8, 4], strides = [1, 1, 1]} : vector<8x8x4xbf16> to vector<1x8x4xbf16>
      %113 = vector.shape_cast %112 : vector<1x8x4xbf16> to vector<8x4xbf16>
      %c0_87 = arith.constant 0 : index
      %c4_88 = arith.constant 4 : index
      %114 = vector.load %arg16[%c0_87, %c4_88] : memref<8x32xbf16, #tpu.memory_space<vmem>>, vector<8x4xbf16>
      tpu.vector_store %arg16[%c0_87, %c4_88], %113 {strides = array<i32>} : memref<8x32xbf16, #tpu.memory_space<vmem>>, vector<8x4xbf16>,
      %115 = vector.extract_strided_slice %108 {offsets = [2, 0, 0], sizes = [1, 8, 4], strides = [1, 1, 1]} : vector<8x8x4xbf16> to vector<1x8x4xbf16>
      %116 = vector.shape_cast %115 : vector<1x8x4xbf16> to vector<8x4xbf16>
      %c0_89 = arith.constant 0 : index
      %c8 = arith.constant 8 : index
      %117 = vector.load %arg16[%c0_89, %c8] : memref<8x32xbf16, #tpu.memory_space<vmem>>, vector<8x4xbf16>
      tpu.vector_store %arg16[%c0_89, %c8], %116 {strides = array<i32>} : memref<8x32xbf16, #tpu.memory_space<vmem>>, vector<8x4xbf16>,
      %118 = vector.extract_strided_slice %108 {offsets = [3, 0, 0], sizes = [1, 8, 4], strides = [1, 1, 1]} : vector<8x8x4xbf16> to vector<1x8x4xbf16>
      %119 = vector.shape_cast %118 : vector<1x8x4xbf16> to vector<8x4xbf16>
      %c0_90 = arith.constant 0 : index
      %c12 = arith.constant 12 : index
      %120 = vector.load %arg16[%c0_90, %c12] : memref<8x32xbf16, #tpu.memory_space<vmem>>, vector<8x4xbf16>
      tpu.vector_store %arg16[%c0_90, %c12], %119 {strides = array<i32>} : memref<8x32xbf16, #tpu.memory_space<vmem>>, vector<8x4xbf16>,
      %121 = vector.extract_strided_slice %108 {offsets = [4, 0, 0], sizes = [1, 8, 4], strides = [1, 1, 1]} : vector<8x8x4xbf16> to vector<1x8x4xbf16>
      %122 = vector.shape_cast %121 : vector<1x8x4xbf16> to vector<8x4xbf16>
      %c0_91 = arith.constant 0 : index
      %c16 = arith.constant 16 : index
      %123 = vector.load %arg16[%c0_91, %c16] : memref<8x32xbf16, #tpu.memory_space<vmem>>, vector<8x4xbf16>
      tpu.vector_store %arg16[%c0_91, %c16], %122 {strides = array<i32>} : memref<8x32xbf16, #tpu.memory_space<vmem>>, vector<8x4xbf16>,
      %124 = vector.extract_strided_slice %108 {offsets = [5, 0, 0], sizes = [1, 8, 4], strides = [1, 1, 1]} : vector<8x8x4xbf16> to vector<1x8x4xbf16>
      %125 = vector.shape_cast %124 : vector<1x8x4xbf16> to vector<8x4xbf16>
      %c0_92 = arith.constant 0 : index
      %c20 = arith.constant 20 : index
      %126 = vector.load %arg16[%c0_92, %c20] : memref<8x32xbf16, #tpu.memory_space<vmem>>, vector<8x4xbf16>
      tpu.vector_store %arg16[%c0_92, %c20], %125 {strides = array<i32>} : memref<8x32xbf16, #tpu.memory_space<vmem>>, vector<8x4xbf16>,
      %127 = vector.extract_strided_slice %108 {offsets = [6, 0, 0], sizes = [1, 8, 4], strides = [1, 1, 1]} : vector<8x8x4xbf16> to vector<1x8x4xbf16>
      %128 = vector.shape_cast %127 : vector<1x8x4xbf16> to vector<8x4xbf16>
      %c0_93 = arith.constant 0 : index
      %c24 = arith.constant 24 : index
      %129 = vector.load %arg16[%c0_93, %c24] : memref<8x32xbf16, #tpu.memory_space<vmem>>, vector<8x4xbf16>
      tpu.vector_store %arg16[%c0_93, %c24], %128 {strides = array<i32>} : memref<8x32xbf16, #tpu.memory_space<vmem>>, vector<8x4xbf16>,
      %130 = vector.extract_strided_slice %108 {offsets = [7, 0, 0], sizes = [1, 8, 4], strides = [1, 1, 1]} : vector<8x8x4xbf16> to vector<1x8x4xbf16>
      %131 = vector.shape_cast %130 : vector<1x8x4xbf16> to vector<8x4xbf16>
      %c0_94 = arith.constant 0 : index
      %c28 = arith.constant 28 : index
      %132 = vector.load %arg16[%c0_94, %c28] : memref<8x32xbf16, #tpu.memory_space<vmem>>, vector<8x4xbf16>
      tpu.vector_store %arg16[%c0_94, %c28], %131 {strides = array<i32>} : memref<8x32xbf16, #tpu.memory_space<vmem>>, vector<8x4xbf16>,
      %c0_95 = arith.constant 0 : index
      %c0_96 = arith.constant 0 : index
      %133 = vector.load %arg16[%c0_95, %c0_96] : memref<8x32xbf16, #tpu.memory_space<vmem>>, vector<8x32xbf16>
      %c0_97 = arith.constant 0 : index
      %c0_98 = arith.constant 0 : index
      %134 = vector.load %arg7[%c0_97, %c0_98] : memref<32x32xbf16, #tpu.memory_space<vmem>>, vector<32x32xbf16>
      %cst_99 = arith.constant dense<0.000000e+00> : vector<8x32xf32>
      %135 = tpu.matmul %133, %134, %cst_99 {dimension_numbers = #tpu.dot_dimension_numbers<[1], [0], [0], [1], [0, 0, 1, 1], [], []>} : vector<8x32xbf16>, vector<32x32xbf16>, vector<8x32xf32> -> vector<8x32xf32>
      %c0_100 = arith.constant 0 : index
      %c0_101 = arith.constant 0 : index
      %136 = vector.load %arg8[%c0_100, %c0_101] : memref<1x32xf32, #tpu.memory_space<vmem>>, vector<1x32xf32>
      %137 = vector.broadcast %136 : vector<1x32xf32> to vector<8x32xf32>
      %138 = arith.addf %135, %137 : vector<8x32xf32>
      %c0_102 = arith.constant 0 : index
      %c0_103 = arith.constant 0 : index
      %c0_104 = arith.constant 0 : index
      %139 = vector.load %arg9[%c0_102, %c0_103, %c0_104] : memref<1x8x32xf32, #tpu.memory_space<vmem>>, vector<1x8x32xf32>
      %140 = vector.shape_cast %139 : vector<1x8x32xf32> to vector<8x32xf32>
      %141 = vector.shape_cast %138 : vector<8x32xf32> to vector<1x8x32xf32>
      tpu.vector_store %arg9[%c0_102, %c0_103, %c0_104], %141 {strides = array<i32>} : memref<1x8x32xf32, #tpu.memory_space<vmem>>, vector<1x8x32xf32>,
    } else {
    }
    return
  }
  func.func @transform_0(%arg0: i32, %arg1: i32, %arg2: i32) -> (i32, i32, i32) {
    %c0_i32 = arith.constant 0 : i32
    %c0_i32_0 = arith.constant 0 : i32
    return %arg0, %arg1, %c0_i32 : i32, i32, i32
  }
  func.func @transform_1(%arg0: i32, %arg1: i32, %arg2: i32) -> (i32, i32, i32) {
    %c0_i32 = arith.constant 0 : i32
    %c0_i32_0 = arith.constant 0 : i32
    return %arg0, %arg2, %c0_i32 : i32, i32, i32
  }
  func.func @transform_2(%arg0: i32, %arg1: i32, %arg2: i32) -> (i32, i32) {
    %c0_i32 = arith.constant 0 : i32
    %c0_i32_0 = arith.constant 0 : i32
    %c0_i32_1 = arith.constant 0 : i32
    return %c0_i32, %c0_i32_0 : i32, i32
  }
  func.func @transform_3(%arg0: i32, %arg1: i32, %arg2: i32) -> (i32, i32) {
    %c0_i32 = arith.constant 0 : i32
    %c0_i32_0 = arith.constant 0 : i32
    %c0_i32_1 = arith.constant 0 : i32
    return %c0_i32, %c0_i32_0 : i32, i32
  }
  func.func @transform_4(%arg0: i32, %arg1: i32, %arg2: i32) -> (i32, i32) {
    %c0_i32 = arith.constant 0 : i32
    %c0_i32_0 = arith.constant 0 : i32
    %c0_i32_1 = arith.constant 0 : i32
    return %c0_i32, %c0_i32_0 : i32, i32
  }
  func.func @transform_5(%arg0: i32, %arg1: i32, %arg2: i32) -> (i32, i32) {
    %c0_i32 = arith.constant 0 : i32
    %c0_i32_0 = arith.constant 0 : i32
    %c0_i32_1 = arith.constant 0 : i32
    return %c0_i32, %c0_i32_0 : i32, i32
  }
  func.func @transform_6(%arg0: i32, %arg1: i32, %arg2: i32) -> (i32, i32, i32) {
    %c0_i32 = arith.constant 0 : i32
    %c0_i32_0 = arith.constant 0 : i32
    return %arg0, %arg1, %c0_i32 : i32, i32, i32
  }
}

</mosaic_0001>

<bundles_post_ra>
// kernel: tpu_custom_call.1
= control target key start
LH: loop header
LB: loop body
LE: loop exit
PB: predicated region body
PF: predicated region fallthrough
CT: control target
= control target key end

     0   :  { %s2519_s0 = inlined_call_operand.hbm [shape: f32[2,8,32], index: 0, kind: input, shape index: {}]   ;;  %s2520_s1 = inlined_call_operand.hbm [shape: f32[2,8,32], index: 1, kind: input, shape index: {}]   ;;  %s2521_s2 = inlined_call_operand.hbm [shape: bf16[32,32], index: 2, kind: input, shape index: {}]   ;;  %s2522_s3 = inlined_call_operand.hbm [shape: bf16[32,64], index: 3, kind: input, shape index: {}]   ;;  %s2523_s4 = inlined_call_operand.hbm [shape: bf16[32,32], index: 4, kind: input, shape index: {}]   ;;  %s2524_s5 = inlined_call_operand.vmem [shape: f32[1,32], index: 5, kind: input, shape index: {}]   ;;  %s2525_s6 = inlined_call_operand.hbm [shape: f32[2,8,32], index: 6, kind: output, shape index: {}]  }
   0x1   :  { %2529 = sst [smem:[#allocation28_spill]] %s2521_s2 }
   0x2   :  { %2530 = sst [smem:[#allocation29_spill]] %s2522_s3 }
   0x3   :  { %2531 = sst [smem:[#allocation30_spill]] %s2523_s4 }
   0x4   :  { %11 = vsyncpa [#allocation10], 0 }
   0x5   :  { %13 = vsyncpa [#allocation10 + $0x1], 0 }
   0x6   :  { %14 = vsyncpa [#allocation13], 0 }
   0x7   :  { %16 = vsyncpa [#allocation13 + $0x1], 0 }
   0x8   :  { %17 = vsyncpa [#allocation16], 0 }
   0x9   :  { %18 = vsyncpa [#allocation11], 0 }
   0xa   :  { %20 = vsyncpa [#allocation11 + $0x1], 0  ;;  %s2081_s21 = smov 0   ;;  %s2083_s22 = smov 0  }
   0xb   :  { %s2085_s23 = smov 0   ;;  %s2087_s24 = smov 0  }
   0xc   :  { %s2089_s25 = smov 0   ;;  %s2091_s26 = smov 0  }
   0xd LB: > { %2532 = sst [smem:[#allocation24_spill]] %s2002_s23  ;;  %s2112_s27 = sadd.s32 4294967295, %s2014_s26   ;;  %s2014_s26 = sphi %s2091_s26, %s26_s26   ;;  %s2010_s25 = sphi %s2089_s25, %s2548_s25   ;;  %s2006_s24 = sphi %s2087_s24, %s2547_s24   ;;  %s2002_s23 = sphi %s2085_s23, %s2546_s23   ;;  %s1998_s22 = sphi %s2083_s22, %s2550_s22   ;;  %s1994_s21 = sphi %s2081_s21, %s2549_s21  }
   0xe   : > { %2533 = sst [smem:[#allocation25_spill]] %s2010_s25  ;;  %p1524_p0 = scmp.ge.s32.totalorder %s2014_s26, 1 }
   0xf   : > { %p68_p1 = scmp.eq.s32.totalorder %s2112_s27, 0  ;;  %p218_p2 = scmp.lt.s32.totalorder %s2014_s26, 3 }
  0x10   : > { %s2534_s2 = sld [smem:[#allocation28_spill]]  ;;  %s2016_s8 = smov [#allocation14]  }
  0x11   : > { %p2120_p3 = pnand %p1524_p0, %p218_p2  ;;  %s231_s9 = sshll.u32 %s2016_s8, 4  ;;  %s232_s9 = int_to_ptr.vmem [resolvable:$true] %s231_s9 }
  0x12   : > { %p1528_p6 = scmp.ge.s32.totalorder %s2014_s26, 2  ;;  %s2537_s3 = sld [smem:[#allocation29_spill]] }
  0x13   : > { %p1611_p4 = pneg %p2120_p3  ;;  %s2017_s14 = smov 64  }
  0x14   : > { %s2018_s15 = smov 4   ;;  %s2019_s16 = smov [#allocation15]  }
  0x15   : > { %p2128_p5 = pnand %p1611_p4, %p68_p1  ;;  %s245_s17 = sshll.u32 %s2019_s16, 4  ;;  %s246_s17 = int_to_ptr.vmem [resolvable:$true] %s245_s17 }
  0x16   : > { %s229_s30 = sshll.u32 %s2534_s2, 4  ;;  %s2538_s4 = sld [smem:[#allocation30_spill]]  ;;  %s230_s30 = int_to_ptr.hbm [resolvable:$true] %s229_s30 }
  0x17   : > { %1614 = dma.hbm_to_vmem [thread:$0]  (!%p2128_p5), %s230_s30, 256, %s232_s9, [#allocation13], %s2017_s14, %s2017_s14, %s2018_s15  }
  0x18   : > { %s243_s13 = sshll.u32 %s2537_s3, 4  ;;  %s2020_s28 = smov [#allocation17]   ;;  %s244_s13 = int_to_ptr.hbm [resolvable:$true] %s243_s13 }
  0x19   : > { %1617 = dma.hbm_to_vmem [thread:$0]  (!%p2128_p5), %s244_s13, 256, %s246_s17, [#allocation16], %s2017_s14, %s2017_s14, %s2018_s15  }
  0x1a   : > { %s259_s29 = sshll.u32 %s2020_s28, 4  ;;  %s1523_s30 = sadd.s32 4294967294, %s2014_s26   ;;  %s260_s29 = int_to_ptr.vmem [resolvable:$true] %s259_s29 }
  0x1b   : > { %s45_s8 = sadd.s32 1, %s2010_s25  ;;  %s54_s9 = sadd.s32 1, %s2002_s23 }
  0x1c   : > { %s257_s20 = sshll.u32 %s2538_s4, 4  ;;  %p47_p7 = scmp.ge.s32.totalorder %s45_s8, 2  ;;  %s258_s20 = int_to_ptr.hbm [resolvable:$true] %s257_s20 }
  0x1d   : > { %1620 = dma.hbm_to_vmem [thread:$0]  (!%p2128_p5), %s258_s20, 256, %s260_s29, [#allocation16], %s2017_s14, %s2017_s14, %s2018_s15  }
  0x1e   : > { %p61_p8 = scmp.ne.s32.totalorder %s2002_s23, %s1998_s22  ;;  %p62_p9 = scmp.eq.s32.totalorder %s2014_s26, 0 }
  0x1f   : > { %p67_p10 = scmp.ne.s32.totalorder %s1998_s22, %s1994_s21  ;;  %s2552_s8 = smov (%p47_p7, %s45_s8), 0 }
  0x20   : > { %2539 = sst [smem:[#allocation26_spill]] %s2552_s8  ;;  %p2155_p11 = por %p62_p9, %p61_p8 }
  0x21   : > { %p2161_p12 = por %p68_p1, %p67_p10  ;;  %s49_s12 = ssub.s32 %s2010_s25, %s2552_s8 }
  0x22   : > { %p205_p13 = scmp.eq.s32.totalorder %s2112_s27, 1  ;;  %p52_p0 = scmp.eq.s32.totalorder %s49_s12, 0 }
  0x23   : > { %p211_p2 = scmp.eq.s32.totalorder %s1523_s30, 1  ;;  %p1635_p5 = scmp.lt.s32.totalorder %s2014_s26, 2 }
  0x24   : > { %p2168_p4 = por %p205_p13, %p61_p8  ;;  %s276_s16 = sand.u32 1, %s2002_s23  }
  0x25   : > { %s2174_s14 = scalar_select %p52_p0, %s2002_s23, %s54_s9  }
  0x26   : > { %p2176_p7 = por %p211_p2, %p67_p10  ;;  %s1529_s17 = sshll.u32 %s276_s16, 3 }
  0x27   : > { %2543 = sst [smem:[#allocation27_spill]] %s2174_s14  ;;  %s1530_s18 = sshll.u32 %s2010_s25, 3 }
  0x28   : > { %s285_s28 = scalar_lea.hbm %s2519_s0, %s1530_s18  ;;  %s280_s29 = scalar_lea.vmem [#allocation9], %s1529_s17 }
  0x29   : > { %s289_s30 = sshll.u32 %s280_s29, 4  ;;  %s287_s12 = sshll.u32 %s285_s28, 4  ;;  %s290_s30 = int_to_ptr.vmem [resolvable:$true] %s289_s30  ;;  %s288_s12 = int_to_ptr.hbm [resolvable:$true] %s287_s12 }
  0x2a   : > { %p1622_p8 = pnand %p1635_p5, %p2155_p11  ;;  %s305_s3 = scalar_lea.hbm %s2520_s1, %s1530_s18 }
  0x2b   : > { %s296_s4 = sand.u32 1, %s2014_s26   ;;  %s277_s8 = scalar_lea.sflag [#allocation10], %s276_s16 }
  0x2c   : > { %1624 = dma.hbm_to_vmem [thread:$0]  (!%p1622_p8), %s288_s12, 128, %s290_s30, %s277_s8  }
  0x2d   : > { %s307_s14 = sshll.u32 %s305_s3, 4  ;;  %s300_s25 = scalar_lea.vmem [#allocation12], %s1529_s17  ;;  %s308_s14 = int_to_ptr.hbm [resolvable:$true] %s307_s14 }
  0x2e   : > { %s309_s23 = sshll.u32 %s300_s25, 4  ;;  %s297_s19 = scalar_lea.sflag [#allocation13], %s296_s4  ;;  %s310_s23 = int_to_ptr.vmem [resolvable:$true] %s309_s23 }
  0x2f   : > { %1627 = dma.hbm_to_vmem [thread:$0]  (!%p1622_p8), %s308_s14, 128, %s310_s23, %s297_s19  }
  0x30   : > { %318 = sbr.rel (%p2120_p3) target bundleno = 1286 (0x506), region = 44  ;;  %s2194_s11 = sand.u32 (!%p2120_p3), 1, %s1998_s22  }
  0x31   : > { %s2197_s2 = sshll.u32 (!%p2120_p3), %s2194_s11, 3  ;;  %s321_s8 = scalar_lea.sflag (!%p2120_p3), [#allocation10], %s2194_s11 }
  0x32   : > { %s324_s3 = scalar_lea.vmem (!%p2120_p3), [#allocation9], %s2197_s2 }
  0x35   : > { %1973 = dma.done.wait (%p2161_p12), %s321_s8, 128  }
  0x36   : > { %1975 = vsyncadd (%p2161_p12), %s321_s8, 4294967168  ;;  %s330_s4 = sand.u32 1, %s2112_s27   ;;  %s334_s25 = scalar_lea.vmem [#allocation12], %s2197_s2 }
  0x37   : > { %s331_s23 = scalar_lea.sflag [#allocation13], %s330_s4 }
  0x38   : > { %1977 = dma.done.wait (%p2161_p12), %s331_s23, 128  }
  0x39   : > { %1979 = vsyncadd (%p2161_p12), %s331_s23, 4294967168 }
  0x3a   : > { %1981 = dma.done.wait (%p68_p1), [#allocation13], 256  }
  0x3b   : > { %1983 = vsyncadd (%p68_p1), [#allocation13], 4294967040 }
  0x3c   : > { %1985 = dma.done.wait (%p68_p1), [#allocation16], 512  }
  0x3d   : > { %1987 = vsyncadd (%p68_p1), [#allocation16], 4294966784  ;;  %v1588_v0 = vld [vmem:[#allocation14 + $0x8] sm:$0xff]  ;;  %v1590_v1 = vld [vmem:[#allocation15 + $0x8] sm:$0xff]  ;;  %vm407_vm0 = vcmask 261120   ;;  %vm425_vm1 = vcmask 27648  }
  0x3e   : > { %v1587_v2 = vld [vmem:[#allocation14] sm:$0xff]  ;;  %v1589_v3 = vld [vmem:[#allocation15] sm:$0xff]  ;;  %417 = vmatpush.bf16.msra.mxu0 %v1588_v0  ;;  %517 = vmatpush.bf16.msra.mxu1 %v1590_v1  ;;  %s2021_s27 = smov 112   ;;  %s2022_s7 = smov 120   ;;  %vm480_vm2 = vcmask 31744   ;;  %vm779_vm3 = vcmask 64512  }
  0x3f   : > { %v389_v4 = vld [vmem:[%s324_s3] sm:$0xff]  ;;  %v489_v5 = vld [vmem:[%s334_s25] sm:$0xff]  ;;  %s2023_s10 = smov 124   ;;  %s2024_s14 = smov 108   ;;  %vm1032_vm4 = vcmask 1043456   ;;  %vm463_vm5 = vcmask 7168  }
  0x40   : > { %v390_v6 = vpack.c.bf16 %v389_v4, %v389_v4  ;;  %v490_v7 = vpack.c.bf16 %v489_v5, %v489_v5  ;;  %s2025_s16 = smov 116   ;;  %s2026_s17 = smov 100   ;;  %v2031_v0 = vmov -inf   ;;  %v2032_v1 = vmov 0.0  }
  0x41   : > { %s2027_s18 = smov 104   ;;  %s2028_s20 = smov 96   ;;  %464 = vst.msk [vmem:[#allocation5] sm:$0xff] %vm463_vm5, %v2031_v0  ;;  %vm1294_vm6 = vcmask 60448   ;;  %vm1300_vm7 = vcmask 93248   ;;  %vm1306_vm8 = vcmask 126048  }
  0x42   : > { %418 = vmatpush.bf16.msra.mxu0 %v1587_v2  ;;  %518 = vmatpush.bf16.msra.mxu1 %v1589_v3  ;;  %s2029_s28 = smov 92   ;;  %s2030_s29 = smov 88   ;;  %465 = vst.msk [vmem:[#allocation5 + $0x8] sm:$0xff] %vm463_vm5, %v2031_v0  ;;  %v2033_v3 = vmov 0   ;;  %vm1312_vm9 = vcmask 158848   ;;  %vm1318_vm10 = vcmask 191648  }
  0x43   : > { %466 = vst.msk [vmem:[#allocation5 + $0x10] sm:$0xff] %vm463_vm5, %v2031_v0  ;;  %1718 = vset.pattern.permute.xlu0 %v2033_v3  ;;  %1719 = vset.pattern.permute.xlu2 %v2033_v3  ;;  %s2034_s30 = smov 76   ;;  %s2035_s12 = smov 84   ;;  %vm1324_vm11 = vcmask 224448   ;;  %vm1330_vm12 = vcmask 257248  }
  0x44   : > { %467 = vst.msk [vmem:[#allocation5 + $0x18] sm:$0xff] %vm463_vm5, %v2031_v0  ;;  %1720 = vset.pattern.permute.xlu1 %v2033_v3  ;;  %s2036_s9 = smov 80   ;;  %s2037_s19 = smov 68  }
  0x45   : > { %1548 = vmatmul.msk.bf16.vlgmr.msra.gmra.mxu0 %vm407_vm0, %v390_v6  ;;  %1557 = vmatmul.msk.bf16.vlgmr.msra.gmra.mxu1 %vm407_vm0, %v490_v7  ;;  %468 = vst.msk [vmem:[#allocation5 + $0x20] sm:$0xff] %vm463_vm5, %v2031_v0  ;;  %s2038_s8 = smov 72   ;;  %s2039_s3 = smov 4  }
  0x46   : > { %469 = vst.msk [vmem:[#allocation5 + $0x28] sm:$0xff] %vm463_vm5, %v2031_v0  ;;  %s2040_s4 = smov 16   ;;  %s2041_s23 = smov 28  }
  0x47   : > { %470 = vst.msk [vmem:[#allocation5 + $0x30] sm:$0xff] %vm463_vm5, %v2031_v0  ;;  %s2042_s25 = smov 12  }
  0x48   : > { %471 = vst.msk [vmem:[#allocation5 + $0x38] sm:$0xff] %vm463_vm5, %v2031_v0  ;;  %v2304_v6 = vld [vmem:[#allocation5] sm:$0xff] }
  0x49   : > { %482 = vst.msk [vmem:[#allocation7 + $0x8] sm:$0xff] %vm480_vm2, %v2032_v1 }
  0x4a   : > { %472 = vst.msk [vmem:[#allocation6] sm:$0xff] %vm463_vm5, %v2032_v1 }
  0x4b   : > { %473 = vst.msk [vmem:[#allocation6 + $0x8] sm:$0xff] %vm463_vm5, %v2032_v1 }
  0x4c   : > { %474 = vst.msk [vmem:[#allocation6 + $0x10] sm:$0xff] %vm463_vm5, %v2032_v1 }
  0x4d   : > { %475 = vst.msk [vmem:[#allocation6 + $0x18] sm:$0xff] %vm463_vm5, %v2032_v1 }
  0x4e   : > { %476 = vst.msk [vmem:[#allocation6 + $0x20] sm:$0xff] %vm463_vm5, %v2032_v1 }
  0x4f   : > { %477 = vst.msk [vmem:[#allocation6 + $0x28] sm:$0xff] %vm463_vm5, %v2032_v1 }
  0x50   : > { %478 = vst.msk [vmem:[#allocation6 + $0x30] sm:$0xff] %vm463_vm5, %v2032_v1 }
  0x51   : > { %479 = vst.msk [vmem:[#allocation6 + $0x38] sm:$0xff] %vm463_vm5, %v2032_v1 }
  0x52   : > { %481 = vst.msk [vmem:[#allocation7] sm:$0xff] %vm480_vm2, %v2032_v1 }
  0x53   : > { %483 = vst.msk [vmem:[#allocation7 + $0x10] sm:$0xff] %vm480_vm2, %v2032_v1 }
  0x54   : > { %484 = vst.msk [vmem:[#allocation7 + $0x18] sm:$0xff] %vm480_vm2, %v2032_v1 }
  0x55   : > { %485 = vst.msk [vmem:[#allocation7 + $0x20] sm:$0xff] %vm480_vm2, %v2032_v1 }
  0x56   : > { %486 = vst.msk [vmem:[#allocation7 + $0x28] sm:$0xff] %vm480_vm2, %v2032_v1 }
  0x57   : > { %487 = vst.msk [vmem:[#allocation7 + $0x30] sm:$0xff] %vm480_vm2, %v2032_v1 }
  0x58   : > { %488 = vst.msk [vmem:[#allocation7 + $0x38] sm:$0xff] %vm480_vm2, %v2032_v1 }
  0xc2   : > { %v420_v8 = vpop.f32.mrf.mxu0  ;;  %v520_v9 = vpop.f32.mrf.mxu1 }
  0xc3   : > { %v424_v10 = vpack.c.bf16 %v420_v8, %v420_v8  ;;  %v2221_v11 = vpack.c.bf16 %v520_v9, %v520_v9 }
  0xc5   : > { %426 = vst.msk [vmem:[#allocation2] sm:$0xf] %vm425_vm1, %v424_v10  ;;  %562 = vrot.lane.b32.xlu2 %v2221_v11, %s2021_s27  ;;  %542 = vrot.lane.b32.xlu1 %v2221_v11, %s2022_s7 }
  0xc6   : > { %526 = vst.msk [vmem:[#allocation3] sm:$0xf] %vm425_vm1, %v2221_v11  ;;  %532 = vrot.lane.b32.xlu0 %v2221_v11, %s2023_s10 }
  0xca   : > { %v422_v12 = vpop.f32.mrf.mxu0  ;;  %v522_v13 = vpop.f32.mrf.mxu1 }
  0xcc   : > { %v602_v16 = vld [vmem:[#allocation2] sm:$0xf] }
  0xcd   : > { %572 = vrot.lane.b32.xlu2 %v2221_v11, %s2024_s14  ;;  %552 = vrot.lane.b32.xlu1 %v2221_v11, %s2025_s16  ;;  %v610_v14 = vld [vmem:[#allocation3] sm:$0xf] }
  0xce   : > { %428 = vrot.lane.b32.xlu0 %v424_v10, %s2023_s10  ;;  %v623_v15 = vsel %vm480_vm2, %v610_v14, 0  ;;  %s2045_s10 = smov 20  }
  0xcf   : > { %632 = vmatpush.bf16.xpose.msra.mxu2 %v623_v15 }
  0xd5   : > { %443 = vrot.lane.b32.xlu2 %v424_v10, %s2021_s27  ;;  %438 = vrot.lane.b32.xlu1 %v424_v10, %s2025_s16  ;;  %s2043_s27 = smov 8  }
  0xd6   : > { %433 = vrot.lane.b32.xlu0 %v424_v10, %s2022_s7  ;;  %1558 = vmatmul.msk.bf16.vlgmr.msra.gmra.mxu2 %vm480_vm2, %v602_v16  ;;  %s2044_s7 = smov 24  }
  0xdd   : > { %592 = vrot.lane.b32.xlu2 %v2221_v11, %s2026_s17  ;;  %582 = vrot.lane.b32.xlu1 %v2221_v11, %s2027_s18 }
  0xde   : > { %448 = vrot.lane.b32.xlu0 %v424_v10, %s2024_s14  ;;  %s1584_s14 = sshll.u32 %s2006_s24, 3 }
  0xe5   : > { %458 = vrot.lane.b32.xlu1 %v424_v10, %s2026_s17 }
  0xe6   : > { %453 = vrot.lane.b32.xlu0 %v424_v10, %s2027_s18  ;;  %s1382_s18 = scalar_lea.hbm %s2525_s6, %s1584_s14 }
  0xed   : > { %528 = vrot.lane.b32.xlu1 %v2221_v11, %s2028_s20 }
  0xf5   : > { %537 = vrot.lane.b32.xlu1 %v2221_v11, %s2029_s28 }
  0xfd   : > { %547 = vrot.lane.b32.xlu1 %v2221_v11, %s2030_s29  ;;  %s383_s29 = scalar_lea.vmem [#allocation18], %s2197_s2  ;;  %s1940_s2 = scalar_lea.hbm %s2525_s6, 16 }
 0x11f   : > { %v563_v17 = vpop.permute.xlu2 %562 }
 0x120   : > { %566 = vst.msk [vmem:[#allocation3 + $0x10] sm:$0xf] %vm425_vm1, %v563_v17 }
 0x127   : > { %v573_v18 = vpop.permute.xlu2 %572  ;;  %v614_v19 = vld [vmem:[#allocation3 + $0x10] sm:$0xf] }
 0x128   : > { %576 = vst.msk [vmem:[#allocation3 + $0x14] sm:$0xf] %vm425_vm1, %v573_v18  ;;  %v699_v20 = vsel %vm480_vm2, %v614_v19, 0 }
 0x129   : > { %708 = vmatpush.bf16.xpose.msrb.mxu2 %v699_v20 }
 0x12f   : > { %v444_v21 = vpop.permute.xlu2 %443  ;;  %v615_v28 = vld [vmem:[#allocation3 + $0x14] sm:$0xf] }
 0x130   : > { %447 = vst.msk [vmem:[#allocation2 + $0x10] sm:$0xf] %vm425_vm1, %v444_v21  ;;  %v718_v33 = vsel %vm480_vm2, %v615_v28, 0 }
 0x137   : > { %v543_v22 = vpop.permute.xlu1 %542  ;;  %v593_v23 = vpop.permute.xlu2 %592  ;;  %v606_v24 = vld [vmem:[#allocation2 + $0x10] sm:$0xf] }
 0x138   : > { %546 = vst.msk [vmem:[#allocation3 + $0x8] sm:$0xf] %vm425_vm1, %v543_v22  ;;  %v533_v25 = vpop.permute.xlu0 %532  ;;  %1562 = vmatmul.msk.bf16.vlgmr.msrb.gmra.mxu2 %vm480_vm2, %v606_v24 }
 0x139   : > { %536 = vst.msk [vmem:[#allocation3 + $0x4] sm:$0xf] %vm425_vm1, %v533_v25 }
 0x13a   : > { %596 = vst.msk [vmem:[#allocation3 + $0x1c] sm:$0xf] %vm425_vm1, %v593_v23 }
 0x13f   : > { %v553_v26 = vpop.permute.xlu1 %552  ;;  %v612_v27 = vld [vmem:[#allocation3 + $0x8] sm:$0xf] }
 0x140   : > { %556 = vst.msk [vmem:[#allocation3 + $0xc] sm:$0xf] %vm425_vm1, %v553_v26  ;;  %v429_v29 = vpop.permute.xlu0 %428  ;;  %v611_v30 = vld [vmem:[#allocation3 + $0x4] sm:$0xf]  ;;  %v661_v31 = vsel %vm480_vm2, %v612_v27, 0 }
 0x141   : > { %432 = vst.msk [vmem:[#allocation2 + $0x4] sm:$0xf] %vm425_vm1, %v429_v29  ;;  %v642_v32 = vsel %vm480_vm2, %v611_v30, 0  ;;  %670 = vmatpush.bf16.xpose.msrb.mxu0 %v661_v31  ;;  %v617_v34 = vld [vmem:[#allocation3 + $0x1c] sm:$0xf]  ;;  %v772_v29 = vld [vmem:[#allocation5 + $0x8] sm:$0xff] }
 0x142   : > { %651 = vmatpush.bf16.xpose.msra.mxu3 %v642_v32  ;;  %v756_v40 = vsel %vm480_vm2, %v617_v34, 0  ;;  %v2340_v30 = vld [vmem:[#allocation5 + $0x18] sm:$0xff]  ;;  %v773_v32 = vld [vmem:[#allocation5 + $0x10] sm:$0xff] }
 0x147   : > { %v439_v35 = vpop.permute.xlu1 %438  ;;  %v613_v36 = vld [vmem:[#allocation3 + $0xc] sm:$0xf] }
 0x148   : > { %442 = vst.msk [vmem:[#allocation2 + $0xc] sm:$0xf] %vm425_vm1, %v439_v35  ;;  %v434_v37 = vpop.permute.xlu0 %433  ;;  %v603_v38 = vld [vmem:[#allocation2 + $0x4] sm:$0xf]  ;;  %v680_v39 = vsel %vm480_vm2, %v613_v36, 0 }
 0x149   : > { %437 = vst.msk [vmem:[#allocation2 + $0x8] sm:$0xf] %vm425_vm1, %v434_v37  ;;  %1559 = vmatmul.msk.bf16.vlgmr.msra.gmra.mxu3 %vm480_vm2, %v603_v38  ;;  %689 = vmatpush.bf16.xpose.msrb.mxu1 %v680_v39 }
 0x14a   : > { %727 = vmatpush.bf16.xpose.msrb.mxu3 %v718_v33 }
 0x14f   : > { %v583_v41 = vpop.permute.xlu1 %582  ;;  %v605_v42 = vld [vmem:[#allocation2 + $0xc] sm:$0xf] }
 0x150   : > { %586 = vst.msk [vmem:[#allocation3 + $0x18] sm:$0xf] %vm425_vm1, %v583_v41  ;;  %v449_v43 = vpop.permute.xlu0 %448  ;;  %v604_v44 = vld [vmem:[#allocation2 + $0x8] sm:$0xf]  ;;  %1561 = vmatmul.msk.bf16.vlgmr.msrb.gmra.mxu1 %vm480_vm2, %v605_v42 }
 0x151   : > { %765 = vmatpush.bf16.xpose.msra.mxu1 %v756_v40  ;;  %452 = vst.msk [vmem:[#allocation2 + $0x14] sm:$0xf] %vm425_vm1, %v449_v43  ;;  %1560 = vmatmul.msk.bf16.vlgmr.msrb.gmra.mxu0 %vm480_vm2, %v604_v44  ;;  %v775_v40 = vld [vmem:[#allocation5 + $0x20] sm:$0xff]  ;;  %v2348_v44 = vld [vmem:[#allocation5 + $0x38] sm:$0xff] }
 0x157   : > { %v459_v45 = vpop.permute.xlu1 %458  ;;  %v616_v46 = vld [vmem:[#allocation3 + $0x18] sm:$0xf] }
 0x158   : > { %462 = vst.msk [vmem:[#allocation2 + $0x1c] sm:$0xf] %vm425_vm1, %v459_v45  ;;  %v454_v47 = vpop.permute.xlu0 %453  ;;  %v607_v48 = vld [vmem:[#allocation2 + $0x14] sm:$0xf]  ;;  %v737_v49 = vsel %vm480_vm2, %v616_v46, 0 }
 0x159   : > { %457 = vst.msk [vmem:[#allocation2 + $0x18] sm:$0xf] %vm425_vm1, %v454_v47  ;;  %v2263_v50 = vpop.f32.mrf.mxu2  ;;  %1563 = vmatmul.msk.bf16.vlgmr.msrb.gmra.mxu3 %vm480_vm2, %v607_v48  ;;  %746 = vmatpush.bf16.xpose.msra.mxu0 %v737_v49  ;;  %v2350_v45 = vld [vmem:[#allocation5 + $0x30] sm:$0xff] }
 0x15a   : > { %v780_v51 = vsel %vm779_vm3, %v2263_v50, -inf }
 0x15b   : > { %781 = vmax.xlane.f32.xlu2 %v780_v51 }
 0x15f   : > { %v529_v52 = vpop.permute.xlu1 %528  ;;  %v609_v53 = vld [vmem:[#allocation2 + $0x1c] sm:$0xf] }
 0x160   : > { %531 = vst.msk [vmem:[#allocation4] sm:$0xf] %vm425_vm1, %v529_v52  ;;  %v608_v54 = vld [vmem:[#allocation2 + $0x18] sm:$0xf]  ;;  %1565 = vmatmul.msk.bf16.vlgmr.msra.gmra.mxu1 %vm480_vm2, %v609_v53 }
 0x161   : > { %v636_v55 = vpop.f32.mrf.mxu2  ;;  %1564 = vmatmul.msk.bf16.vlgmr.msra.gmra.mxu0 %vm480_vm2, %v608_v54 }
 0x167   : > { %v538_v56 = vpop.permute.xlu1 %537  ;;  %v1021_v57 = vld [vmem:[#allocation4] sm:$0xf] }
 0x168   : > { %541 = vst.msk [vmem:[#allocation4 + $0x4] sm:$0xf] %vm425_vm1, %v538_v56  ;;  %v1034_v58 = vsel %vm1032_vm4, %v1021_v57, 0 }
 0x169   : > { %1043 = vmatpush.bf16.msra.mxu2 %v1034_v58 }
 0x16f   : > { %v548_v59 = vpop.permute.xlu1 %547  ;;  %v1022_v60 = vld [vmem:[#allocation4 + $0x4] sm:$0xf] }
 0x170   : > { %551 = vst.msk [vmem:[#allocation4 + $0x8] sm:$0xf] %vm425_vm1, %v548_v59  ;;  %v1053_v61 = vsel %vm1032_vm4, %v1022_v60, 0 }
 0x171   : > { %1062 = vmatpush.bf16.msra.mxu3 %v1053_v61 }
 0x177   : > { %v1023_v62 = vld [vmem:[#allocation4 + $0x8] sm:$0xf] }
 0x178   : > { %v1072_v63 = vsel %vm1032_vm4, %v1023_v62, 0 }
 0x179   : > { %1081 = vmatpush.bf16.msrb.mxu0 %v1072_v63  ;;  %v2377_v63 = vld [vmem:[#allocation5 + $0x28] sm:$0xff] }
 0x1bb   : > { %v2289_v2 = vpop.f32.mrf.mxu2 }
 0x1bc   : > { %v792_v19 = vsel %vm779_vm3, %v2289_v2, -inf }
 0x1c3   : > { %v712_v4 = vpop.f32.mrf.mxu2 }
 0x1cc   : > { %v2302_v5 = vpop.f32.mrf.mxu3 }
 0x1cd   : > { %v2306_v7 = vpop.f32.mrf.mxu1  ;;  %v783_v8 = vsel %vm779_vm3, %v2302_v5, -inf }
 0x1ce   : > { %784 = vmax.xlane.f32.xlu0 %v783_v8  ;;  %v782_v9 = vpop.xlane.xlu2 %781  ;;  %v2310_v10 = vpop.f32.mrf.mxu0  ;;  %v789_v12 = vsel %vm779_vm3, %v2306_v7, -inf }
 0x1cf   : > { %v2315_v13 = vmax.f32 %v2304_v6, %v782_v9  ;;  %790 = vmax.xlane.f32.xlu2 %v789_v12  ;;  %v786_v14 = vsel %vm779_vm3, %v2310_v10, -inf }
 0x1d0   : > { %787 = vmax.xlane.f32.xlu1 %v786_v14 }
 0x1d1   : > { %v812_v15 = vsub.f32 %v2304_v6, %v2315_v13  ;;  %1198 = vst.msk [vmem:[#allocation5] sm:$0xff] %vm463_vm5, %v2315_v13 }
 0x1d4   : > { %v655_v16 = vpop.f32.mrf.mxu3 }
 0x1d5   : > { %v693_v17 = vpop.f32.mrf.mxu1 }
 0x1d6   : > { %v674_v18 = vpop.f32.mrf.mxu0 }
 0x1d7   : > { %793 = vmax.xlane.f32.xlu2 %v792_v19 }
 0x1dc   : > { %v2325_v20 = vpop.f32.mrf.mxu3 }
 0x1dd   : > { %v2327_v21 = vpop.f32.mrf.mxu1  ;;  %v795_v28 = vsel %vm779_vm3, %v2325_v20, -inf }
 0x1de   : > { %v2329_v22 = vpop.f32.mrf.mxu0  ;;  %v801_v23 = vsel %vm779_vm3, %v2327_v21, -inf }
 0x1df   : > { %802 = vmax.xlane.f32.xlu2 %v801_v23  ;;  %v798_v24 = vsel %vm779_vm3, %v2329_v22, -inf }
 0x1e0   : > { %799 = vmax.xlane.f32.xlu1 %v798_v24 }
 0x1e2   : > { %838 = vperm.xlu0 %1718, %v2315_v13  }
 0x1e4   : > { %v731_v25 = vpop.f32.mrf.mxu3 }
 0x1e5   : > { %v769_v26 = vpop.f32.mrf.mxu1 }
 0x1e6   : > { %v750_v27 = vpop.f32.mrf.mxu0 }
 0x1f9   : > { %577 = vrot.lane.b32.xlu1 %v2221_v11, %s2034_s30  ;;  %s1384_s30 = sshll.u32 %s383_s29, 4  ;;  %s1385_s30 = int_to_ptr.vmem [resolvable:$true] %s1384_s30 }
 0x20c   : > { %796 = vmax.xlane.f32.xlu0 %v795_v28 }
 0x220   : > { %557 = vrot.lane.b32.xlu0 %v2221_v11, %s2035_s12  ;;  %s1386_s12 = sshll.u32 %s1382_s18, 4  ;;  %s1387_s12 = int_to_ptr.hbm [resolvable:$true] %s1386_s12 }
 0x221   : > { %s1934_s24 = sshra.s32 %s1387_s12, 4  ;;  %s1935_s24 = int_to_ptr.hbm [resolvable:$true] %s1934_s24 }
 0x222   : > { %p1941_p10 = scmp.lt.s32.totalorder %s1935_s24, %s2525_s6 }
 0x241   : > { %v785_v31 = vpop.xlane.xlu0 %784 }
 0x242   : > { %v805_v33 = vmax.f32 %v772_v29, %v785_v31  ;;  %v791_v34 = vpop.xlane.xlu2 %790 }
 0x243   : > { %v807_v35 = vmax.f32 %v2340_v30, %v791_v34  ;;  %v788_v36 = vpop.xlane.xlu1 %787 }
 0x244   : > { %1199 = vst.msk [vmem:[#allocation5 + $0x8] sm:$0xff] %vm463_vm5, %v805_v33  ;;  %v806_v37 = vmax.f32 %v773_v32, %v788_v36 }
 0x245   : > { %v815_v38 = vsub.f32 %v2340_v30, %v807_v35  ;;  %1201 = vst.msk [vmem:[#allocation5 + $0x18] sm:$0xff] %vm463_vm5, %v807_v35 }
 0x246   : > { %v814_v39 = vsub.f32 %v773_v32, %v806_v37  ;;  %1200 = vst.msk [vmem:[#allocation5 + $0x10] sm:$0xff] %vm463_vm5, %v806_v37  ;;  %848 = vperm.xlu2 %1719, %v806_v37  }
 0x247   : > { %v826_v9 = vmul.f32 1.442695, %v815_v38 }
 0x248   : > { %v824_v8 = vmul.f32 1.442695, %v814_v39 }
 0x24a   : > { %v794_v41 = vpop.xlane.xlu2 %793 }
 0x24b   : > { %v808_v42 = vmax.f32 %v775_v40, %v794_v41 }
 0x24d   : > { %v816_v43 = vsub.f32 %v775_v40, %v808_v42  ;;  %1202 = vst.msk [vmem:[#allocation5 + $0x20] sm:$0xff] %vm463_vm5, %v808_v42  ;;  %858 = vperm.xlu1 %1720, %v808_v42  }
 0x24e   : > { %843 = vperm.xlu2 %1719, %v805_v33  }
 0x24f   : > { %v828_v12 = vmul.f32 1.442695, %v816_v43 }
 0x252   : > { %v803_v46 = vpop.xlane.xlu2 %802 }
 0x253   : > { %v2353_v47 = vmax.f32 %v2348_v44, %v803_v46  ;;  %v800_v48 = vpop.xlane.xlu1 %799 }
 0x254   : > { %v2356_v49 = vmax.f32 %v2350_v45, %v800_v48  ;;  %v839_v51 = vpop.permute.xlu0 %838 }
 0x255   : > { %v819_v52 = vsub.f32 %v2348_v44, %v2353_v47  ;;  %1205 = vst.msk [vmem:[#allocation5 + $0x38] sm:$0xff] %vm463_vm5, %v2353_v47  ;;  %v876_v53 = vsub.f32 %v2263_v50, %v839_v51  ;;  %873 = vperm.xlu1 %1720, %v2353_v47   ;;  %v813_v50 = vsub.f32 %v772_v29, %v805_v33  ;;  %v900_v44 = vld [vmem:[#allocation6] sm:$0xff] }
 0x256   : > { %v818_v54 = vsub.f32 %v2350_v45, %v2356_v49  ;;  %1204 = vst.msk [vmem:[#allocation5 + $0x30] sm:$0xff] %vm463_vm5, %v2356_v49  ;;  %853 = vperm.xlu2 %1719, %v807_v35   ;;  %v902_v45 = vld [vmem:[#allocation6 + $0x10] sm:$0xff] }
 0x257   : > { %v884_v55 = vmul.f32 1.442695, %v876_v53  ;;  %v822_v58 = vmul.f32 1.442695, %v813_v50 }
 0x259   : > { %1722 = vpow2.f32 %v884_v55 }
 0x25a   : > { %1724 = vpow2.f32 %v822_v58 }
 0x25b   : > { %1726 = vpow2.f32 %v824_v8 }
 0x25c   : > { %1728 = vpow2.f32 %v826_v9  ;;  %v834_v9 = vmul.f32 1.442695, %v819_v52 }
 0x25d   : > { %1730 = vpow2.f32 %v828_v12 }
 0x25e   : > { %567 = vrot.lane.b32.xlu2 %v2221_v11, %s2036_s9  ;;  %s1371_s9 = scalar_lea.sflag [#allocation11], %s2194_s11 }
 0x25f   : > { %v1723_v56 = vpop.eup %1722 }
 0x260   : > { %v1013_v57 = vpack.c.bf16 %v1723_v56, %v1723_v56  ;;  %v2374_v62 = vpop.eup %1724  ;;  %v916_v0 = vsel %vm779_vm3, %v1723_v56, 0.0 }
 0x261   : > { %v2389_v14 = vpop.eup %1726 }
 0x262   : > { %1566 = vmatmul.msk.bf16.vlgmr.msra.gmra.mxu2 %vm779_vm3, %v1013_v57  ;;  %v2393_v17 = vpop.eup %1728 }
 0x263   : > { %v2396_v18 = vpop.eup %1730 }
 0x266   : > { %868 = vperm.xlu2 %1719, %v2356_v49  }
 0x26b   : > { %v578_v59 = vpop.permute.xlu1 %577 }
 0x26c   : > { %581 = vst.msk [vmem:[#allocation4 + $0x14] sm:$0xf] %vm425_vm1, %v578_v59 }
 0x26e   : > { %597 = vrot.lane.b32.xlu2 %v2221_v11, %s2037_s19  ;;  %s1936_s19 = scalar_lea.hbm %s1935_s24, 8 }
 0x26f   : > { %p1937_p1 = scmp.ne.s32.totalorder %s1935_s24, %s1936_s19  ;;  %p1942_p11 = scmp.lt.s32.totalorder %s1940_s2, %s1936_s19 }
 0x271   : > { %p1938_p3 = pnand %p1937_p1, %p2168_p4  ;;  %p1943_p12 = por %p1942_p11, %p1941_p10 }
 0x273   : > { %v1026_v60 = vld [vmem:[#allocation4 + $0x14] sm:$0xf]  ;;  %p1939_p9 = pneg %p1938_p3 }
 0x274   : > { %v1129_v61 = vsel %vm1032_vm4, %v1026_v60, 0 }
 0x275   : > { %1138 = vmatpush.bf16.msrb.mxu3 %v1129_v61  ;;  %p1944_p13 = pnand %p1943_p12, %p1939_p9 }
 0x276   : > { %972 = vperm.xlu2 %1719, %v2374_v62  }
 0x27f   : > { %v797_v1 = vpop.xlane.xlu0 %796  ;;  %917 = vadd.xlane.f32.xlu1 %v916_v0 }
 0x280   : > { %v2381_v3 = vmax.f32 %v2377_v63, %v797_v1 }
 0x282   : > { %v817_v4 = vsub.f32 %v2377_v63, %v2381_v3  ;;  %1203 = vst.msk [vmem:[#allocation5 + $0x28] sm:$0xff] %vm463_vm5, %v2381_v3  ;;  %863 = vperm.xlu0 %1718, %v2381_v3  }
 0x284   : > { %v830_v8 = vmul.f32 1.442695, %v817_v4 }
 0x28a   : > { %587 = vrot.lane.b32.xlu0 %v2221_v11, %s2038_s8 }
 0x292   : > { %v558_v16 = vpop.permute.xlu0 %557  ;;  %977 = vperm.xlu0 %1718, %v2389_v14  }
 0x293   : > { %561 = vst.msk [vmem:[#allocation4 + $0xc] sm:$0xf] %vm425_vm1, %v558_v16  ;;  %v820_v16 = vmul.f32 1.442695, %v812_v15 }
 0x298   : > { %982 = vperm.xlu1 %1720, %v2393_v17  }
 0x29a   : > { %987 = vperm.xlu0 %1718, %v2396_v18   ;;  %v1024_v11 = vld [vmem:[#allocation4 + $0xc] sm:$0xf] }
 0x29b   : > { %v1091_v19 = vsel %vm1032_vm4, %v1024_v11, 0 }
 0x29c   : > { %1100 = vmatpush.bf16.msrb.mxu1 %v1091_v19 }
 0x2a0   : > { %v849_v23 = vpop.permute.xlu2 %848 }
 0x2a1   : > { %v878_v24 = vsub.f32 %v2310_v10, %v849_v23 }
 0x2a3   : > { %v888_v25 = vmul.f32 1.442695, %v878_v24 }
 0x2a5   : > { %1732 = vpow2.f32 %v888_v25 }
 0x2a8   : > { %v844_v26 = vpop.permute.xlu2 %843 }
 0x2a9   : > { %v877_v27 = vsub.f32 %v2302_v5, %v844_v26 }
 0x2ab   : > { %v1733_v28 = vpop.eup %1732  ;;  %v886_v29 = vmul.f32 1.442695, %v877_v27 }
 0x2ac   : > { %v1015_v30 = vpack.c.bf16 %v1733_v28, %v1733_v28  ;;  %v922_v43 = vsel %vm779_vm3, %v1733_v28, 0.0 }
 0x2ad   : > { %1734 = vpow2.f32 %v886_v29 }
 0x2ae   : > { %1568 = vmatmul.msk.bf16.vlgmr.msrb.gmra.mxu0 %vm779_vm3, %v1015_v30 }
 0x2b0   : > { %v854_v31 = vpop.permute.xlu2 %853 }
 0x2b1   : > { %v879_v32 = vsub.f32 %v2306_v7, %v854_v31 }
 0x2b3   : > { %v1735_v33 = vpop.eup %1734  ;;  %v890_v34 = vmul.f32 1.442695, %v879_v32  ;;  %v959_v32 = vld [vmem:[#allocation7 + $0x10] sm:$0xff] }
 0x2b4   : > { %v1014_v35 = vpack.c.bf16 %v1735_v33, %v1735_v33  ;;  %v919_v51 = vsel %vm779_vm3, %v1735_v33, 0.0 }
 0x2b5   : > { %1736 = vpow2.f32 %v890_v34 }
 0x2b6   : > { %1567 = vmatmul.msk.bf16.vlgmr.msra.gmra.mxu3 %vm779_vm3, %v1014_v35 }
 0x2b8   : > { %v568_v10 = vpop.permute.xlu2 %567 }
 0x2b9   : > { %571 = vst.msk [vmem:[#allocation4 + $0x10] sm:$0xf] %vm425_vm1, %v568_v10 }
 0x2bb   : > { %v1737_v36 = vpop.eup %1736 }
 0x2bc   : > { %v1016_v5 = vpack.c.bf16 %v1737_v36, %v1737_v36  ;;  %v925_v37 = vsel %vm779_vm3, %v1737_v36, 0.0  ;;  %v903_v36 = vld [vmem:[#allocation6 + $0x18] sm:$0xff] }
 0x2bd   : > { %926 = vadd.xlane.f32.xlu2 %v925_v37 }
 0x2be   : > { %1569 = vmatmul.msk.bf16.vlgmr.msrb.gmra.mxu1 %vm779_vm3, %v1016_v5 }
 0x2bf   : > { %v859_v38 = vpop.permute.xlu1 %858 }
 0x2c0   : > { %v869_v39 = vpop.permute.xlu2 %868  ;;  %v880_v7 = vsub.f32 %v2289_v2, %v859_v38  ;;  %v1025_v40 = vld [vmem:[#allocation4 + $0x10] sm:$0xf]  ;;  %v911_v38 = vmul.f32 %v2393_v17, %v903_v36 }
 0x2c1   : > { %v882_v41 = vsub.f32 %v2329_v22, %v869_v39  ;;  %v1110_v42 = vsel %vm1032_vm4, %v1025_v40, 0  ;;  %v910_v40 = vmul.f32 %v2389_v14, %v902_v45  ;;  %v962_v45 = vld [vmem:[#allocation7 + $0x28] sm:$0xff] }
 0x2c2   : > { %v892_v46 = vmul.f32 1.442695, %v880_v7  ;;  %1119 = vmatpush.bf16.msrb.mxu2 %v1110_v42  ;;  %923 = vadd.xlane.f32.xlu1 %v922_v43 }
 0x2c3   : > { %v896_v48 = vmul.f32 1.442695, %v882_v41  ;;  %v958_v41 = vld [vmem:[#allocation7 + $0x8] sm:$0xff] }
 0x2c4   : > { %1738 = vpow2.f32 %v892_v46  ;;  %920 = vadd.xlane.f32.xlu0 %v919_v51 }
 0x2c5   : > { %1740 = vpow2.f32 %v896_v48  ;;  %v960_v48 = vld [vmem:[#allocation7 + $0x18] sm:$0xff] }
 0x2c7   : > { %v874_v53 = vpop.permute.xlu1 %873 }
 0x2c8   : > { %v598_v55 = vpop.permute.xlu2 %597  ;;  %v883_v2 = vsub.f32 %v2327_v21, %v874_v53 }
 0x2c9   : > { %601 = vst.msk [vmem:[#allocation4 + $0x1c] sm:$0xf] %vm425_vm1, %v598_v55 }
 0x2ca   : > { %v1739_v22 = vpop.eup %1738  ;;  %v898_v56 = vmul.f32 1.442695, %v883_v2 }
 0x2cb   : > { %v1741_v57 = vpop.eup %1740  ;;  %v1017_v50 = vpack.c.bf16 %v1739_v22, %v1739_v22  ;;  %v928_v58 = vsel %vm779_vm3, %v1739_v22, 0.0 }
 0x2cc   : > { %1742 = vpow2.f32 %v898_v56  ;;  %v934_v59 = vsel %vm779_vm3, %v1741_v57, 0.0  ;;  %929 = vadd.xlane.f32.xlu0 %v928_v58  ;;  %v1019_v29 = vpack.c.bf16 %v1741_v57, %v1741_v57  ;;  %v906_v58 = vld [vmem:[#allocation6 + $0x30] sm:$0xff] }
 0x2cd   : > { %935 = vadd.xlane.f32.xlu2 %v934_v59  ;;  %1570 = vmatmul.msk.bf16.vlgmr.msrb.gmra.mxu2 %vm779_vm3, %v1017_v50  ;;  %1744 = vpow2.f32 %v830_v8  ;;  %v904_v50 = vld [vmem:[#allocation6 + $0x20] sm:$0xff] }
 0x2ce   : > { %1746 = vpow2.f32 %v834_v9 }
 0x2cf   : > { %1748 = vpow2.f32 %v820_v16 }
 0x2d0   : > { %v1028_v60 = vld [vmem:[#allocation4 + $0x1c] sm:$0xf]  ;;  %v973_v33 = vpop.permute.xlu2 %972 }
 0x2d1   : > { %v1167_v61 = vsel %vm1032_vm4, %v1028_v60, 0  ;;  %v1006_v53 = vmul.f32 %v973_v33, %v958_v41 }
 0x2d2   : > { %v1743_v0 = vpop.eup %1742  ;;  %1176 = vmatpush.bf16.msra.mxu1 %v1167_v61 }
 0x2d3   : > { %v1020_v21 = vpack.c.bf16 %v1743_v0, %v1743_v0  ;;  %v937_v1 = vsel %vm779_vm3, %v1743_v0, 0.0  ;;  %v2427_v12 = vpop.eup %1744 }
 0x2d4   : > { %938 = vadd.xlane.f32.xlu0 %v937_v1  ;;  %v2433_v11 = vpop.eup %1746 }
 0x2d5   : > { %1573 = vmatmul.msk.bf16.vlgmr.msra.gmra.mxu1 %vm779_vm3, %v1020_v21  ;;  %v2438_v63 = vpop.eup %1748 }
 0x2d6   : > { %v908_v52 = vmul.f32 %v2438_v63, %v900_v44 }
 0x2e5   : > { %992 = vperm.xlu2 %1719, %v2427_v12   ;;  %v2435_v19 = vpop.f32.mrf.mxu2 }
 0x2e8   : > { %1002 = vperm.xlu0 %1718, %v2433_v11  }
 0x2ed   : > { %v1047_v47 = vpop.f32.mrf.mxu2 }
 0x2ee   : > { %v907_v47 = vld [vmem:[#allocation6 + $0x38] sm:$0xff] }
 0x2f2   : > { %v918_v3 = vpop.xlane.xlu1 %917 }
 0x2f3   : > { %v940_v4 = vadd.f32 %v918_v3, %v908_v52 }
 0x2f4   : > { %v864_v23 = vpop.permute.xlu0 %863 }
 0x2f5   : > { %949 = vst.msk [vmem:[#allocation6] sm:$0xff] %vm463_vm5, %v940_v4  ;;  %v881_v6 = vsub.f32 %v2325_v20, %v864_v23  ;;  %v832_v20 = vmul.f32 1.442695, %v818_v54  ;;  %v901_v54 = vld [vmem:[#allocation6 + $0x8] sm:$0xff] }
 0x2f6   : > { %v909_v46 = vmul.f32 %v2374_v62, %v901_v54  ;;  %v912_v62 = vmul.f32 %v2396_v18, %v904_v50  ;;  %v915_v18 = vmul.f32 %v2433_v11, %v907_v47 }
 0x2f7   : > { %v894_v13 = vmul.f32 1.442695, %v881_v6 }
 0x2f9   : > { %1750 = vpow2.f32 %v894_v13 }
 0x2fa   : > { %1752 = vpow2.f32 %v832_v20 }
 0x2fc   : > { %v588_v15 = vpop.permute.xlu0 %587 }
 0x2fd   : > { %591 = vst.msk [vmem:[#allocation4 + $0x18] sm:$0xf] %vm425_vm1, %v588_v15  ;;  %v961_v15 = vld [vmem:[#allocation7 + $0x20] sm:$0xff] }
 0x2ff   : > { %v1751_v24 = vpop.eup %1750 }
 0x300   : > { %v1018_v25 = vpack.c.bf16 %v1751_v24, %v1751_v24  ;;  %v931_v26 = vsel %vm779_vm3, %v1751_v24, 0.0  ;;  %v1753_v30 = vpop.eup %1752 }
 0x301   : > { %932 = vadd.xlane.f32.xlu1 %v931_v26  ;;  %v914_v59 = vmul.f32 %v1753_v30, %v906_v58 }
 0x302   : > { %1571 = vmatmul.msk.bf16.vlgmr.msrb.gmra.mxu3 %vm779_vm3, %v1018_v25 }
 0x304   : > { %v1027_v27 = vld [vmem:[#allocation4 + $0x18] sm:$0xf]  ;;  %v978_v31 = vpop.permute.xlu0 %977 }
 0x305   : > { %v1148_v28 = vsel %vm1032_vm4, %v1027_v27, 0  ;;  %v1007_v34 = vmul.f32 %v978_v31, %v959_v32  ;;  %v1209_v27 = vld [vmem:[#allocation6] sm:$0xff]  ;;  %v964_v32 = vld [vmem:[#allocation7 + $0x38] sm:$0xff] }
 0x306   : > { %1157 = vmatpush.bf16.msra.mxu0 %v1148_v28 }
 0x309   : > { %1572 = vmatmul.msk.bf16.vlgmr.msra.gmra.mxu0 %vm779_vm3, %v1019_v29 }
 0x30a   : > { %v983_v5 = vpop.permute.xlu1 %982 }
 0x30b   : > { %v1008_v2 = vmul.f32 %v983_v5, %v960_v48  ;;  %v905_v5 = vld [vmem:[#allocation6 + $0x28] sm:$0xff] }
 0x30c   : > { %v988_v37 = vpop.permute.xlu0 %987 }
 0x30d   : > { %v1009_v24 = vmul.f32 %v988_v37, %v961_v15  ;;  %v913_v37 = vmul.f32 %v2427_v12, %v905_v5  ;;  %v957_v15 = vld [vmem:[#allocation7] sm:$0xff] }
 0x30e   : > { %v1721_v5 = vld [vmem:[%s2524_s5] ss:$0 sm:$0xff] }
 0x31a   : > { %997 = vperm.xlu1 %1720, %v1753_v30  }
 0x32b   : > { %v1083_v35 = vpop.f32.mrf.mxu0 }
 0x32c   : > { %v1184_v10 = vadd.f32 %v1083_v35, %v1007_v34 }
 0x32e   : > { %1192 = vst.msk [vmem:[#allocation7 + $0x10] sm:$0xff] %vm480_vm2, %v1184_v10 }
 0x330   : > { %v927_v39 = vpop.xlane.xlu2 %926 }
 0x331   : > { %v943_v7 = vadd.f32 %v927_v39, %v911_v38 }
 0x333   : > { %952 = vst.msk [vmem:[#allocation6 + $0x18] sm:$0xff] %vm463_vm5, %v943_v7  ;;  %v1085_v49 = vpop.f32.mrf.mxu0 }
 0x335   : > { %v924_v42 = vpop.xlane.xlu1 %923 }
 0x336   : > { %v942_v43 = vadd.f32 %v924_v42, %v910_v40 }
 0x337   : > { %v921_v51 = vpop.xlane.xlu0 %920 }
 0x338   : > { %951 = vst.msk [vmem:[#allocation6 + $0x10] sm:$0xff] %vm463_vm5, %v942_v43  ;;  %v941_v17 = vadd.f32 %v921_v51, %v909_v46  ;;  %v963_v46 = vld [vmem:[#allocation7 + $0x30] sm:$0xff] }
 0x339   : > { %v1064_v55 = vpop.f32.mrf.mxu3 }
 0x33a   : > { %950 = vst.msk [vmem:[#allocation6 + $0x8] sm:$0xff] %vm463_vm5, %v941_v17  ;;  %v1183_v22 = vadd.f32 %v1064_v55, %v1006_v53  ;;  %v1212_v56 = vld [vmem:[#allocation6 + $0x18] sm:$0xff] }
 0x33b   : > { %v1102_v57 = vpop.f32.mrf.mxu1  ;;  %1754 = vrcp.f32 %v1212_v56 }
 0x33c   : > { %1191 = vst.msk [vmem:[#allocation7 + $0x8] sm:$0xff] %vm480_vm2, %v1183_v22  ;;  %v1185_v14 = vadd.f32 %v1102_v57, %v1008_v2 }
 0x33e   : > { %1193 = vst.msk [vmem:[#allocation7 + $0x18] sm:$0xff] %vm480_vm2, %v1185_v14 }
 0x33f   : > { %v930_v60 = vpop.xlane.xlu0 %929  ;;  %v1211_v61 = vld [vmem:[#allocation6 + $0x10] sm:$0xff] }
 0x340   : > { %v936_v0 = vpop.xlane.xlu2 %935  ;;  %v944_v21 = vadd.f32 %v930_v60, %v912_v62  ;;  %1756 = vrcp.f32 %v1211_v61 }
 0x341   : > { %v1755_v1 = vpop.eup %1754  ;;  %v946_v8 = vadd.f32 %v936_v0, %v914_v59  ;;  %v1066_v9 = vpop.f32.mrf.mxu3  ;;  %v1210_v16 = vld [vmem:[#allocation6 + $0x8] sm:$0xff] }
 0x342   : > { %953 = vst.msk [vmem:[#allocation6 + $0x20] sm:$0xff] %vm463_vm5, %v944_v21  ;;  %1250 = vperm.xlu0 %1718, %v1755_v1   ;;  %1758 = vrcp.f32 %v1210_v16  ;;  %v1227_v9 = vld [vmem:[#allocation7 + $0x10] sm:$0xff] }
 0x343   : > { %955 = vst.msk [vmem:[#allocation6 + $0x30] sm:$0xff] %vm463_vm5, %v946_v8  ;;  %v1104_v44 = vpop.f32.mrf.mxu1  ;;  %v1226_v55 = vld [vmem:[#allocation7 + $0x8] sm:$0xff] }
 0x345   : > { %v1228_v61 = vld [vmem:[#allocation7 + $0x18] sm:$0xff] }
 0x346   : > { %v1757_v52 = vpop.eup %1756 }
 0x347   : > { %v939_v3 = vpop.xlane.xlu0 %938  ;;  %1245 = vperm.xlu1 %1720, %v1757_v52  }
 0x348   : > { %v1759_v4 = vpop.eup %1758  ;;  %v947_v23 = vadd.f32 %v939_v3, %v915_v18  ;;  %v993_v49 = vpop.permute.xlu2 %992 }
 0x349   : > { %1240 = vperm.xlu2 %1719, %v1759_v4   ;;  %v1213_v6 = vld [vmem:[#allocation6 + $0x20] sm:$0xff]  ;;  %v1010_v54 = vmul.f32 %v993_v49, %v962_v45 }
 0x34a   : > { %956 = vst.msk [vmem:[#allocation6 + $0x38] sm:$0xff] %vm463_vm5, %v947_v23  ;;  %1760 = vrcp.f32 %v1213_v6  ;;  %v1215_v13 = vld [vmem:[#allocation6 + $0x30] sm:$0xff] }
 0x34b   : > { %1762 = vrcp.f32 %v1215_v13 }
 0x350   : > { %v1761_v25 = vpop.eup %1760  ;;  %v1121_v26 = vpop.f32.mrf.mxu2 }
 0x351   : > { %v1763_v28 = vpop.eup %1762  ;;  %v1186_v29 = vadd.f32 %v1121_v26, %v1009_v24  ;;  %1255 = vperm.xlu2 %1719, %v1761_v25   ;;  %v1216_v11 = vld [vmem:[#allocation6 + $0x38] sm:$0xff] }
 0x352   : > { %1265 = vperm.xlu0 %1718, %v1763_v28   ;;  %v1178_v20 = vpop.f32.mrf.mxu1  ;;  %1764 = vrcp.f32 %v1216_v11 }
 0x353   : > { %1194 = vst.msk [vmem:[#allocation7 + $0x20] sm:$0xff] %vm480_vm2, %v1186_v29  ;;  %1766 = vrcp.f32 %v1209_v27 }
 0x358   : > { %v1765_v30 = vpop.eup %1764  ;;  %v1123_v31 = vpop.f32.mrf.mxu2 }
 0x359   : > { %v1767_v33 = vpop.eup %1766  ;;  %1270 = vperm.xlu2 %1719, %v1765_v30   ;;  %v1592_v30 = vld [vmem:[#allocation17 + $0x8] sm:$0xff] }
 0x35a   : > { %1235 = vperm.xlu0 %1718, %v1767_v33   ;;  %v1180_v34 = vpop.f32.mrf.mxu1  ;;  %v1003_v35 = vpop.permute.xlu0 %1002  ;;  %v1229_v57 = vld [vmem:[#allocation7 + $0x20] sm:$0xff]  ;;  %1362 = vmatpush.bf16.msra.mxu2 %v1592_v30 }
 0x35b   : > { %v1012_v10 = vmul.f32 %v1003_v35, %v964_v32  ;;  %v1591_v33 = vld [vmem:[#allocation17] sm:$0xff] }
 0x35d   : > { %v1189_v36 = vadd.f32 %v1178_v20, %v1012_v10 }
 0x35e   : > { %1363 = vmatpush.bf16.msra.mxu2 %v1591_v33 }
 0x35f   : > { %1197 = vst.msk [vmem:[#allocation7 + $0x38] sm:$0xff] %vm480_vm2, %v1189_v36 }
 0x366   : > { %v1232_v59 = vld [vmem:[#allocation7 + $0x38] sm:$0xff] }
 0x374   : > { %v933_v38 = vpop.xlane.xlu1 %932 }
 0x375   : > { %v945_v39 = vadd.f32 %v933_v38, %v913_v37 }
 0x377   : > { %954 = vst.msk [vmem:[#allocation6 + $0x28] sm:$0xff] %vm463_vm5, %v945_v39 }
 0x37e   : > { %v1214_v7 = vld [vmem:[#allocation6 + $0x28] sm:$0xff] }
 0x37f   : > { %1768 = vrcp.f32 %v1214_v7 }
 0x385   : > { %v1769_v40 = vpop.eup %1768  ;;  %v1140_v41 = vpop.f32.mrf.mxu3 }
 0x386   : > { %v1187_v42 = vadd.f32 %v1140_v41, %v1010_v54  ;;  %1260 = vperm.xlu1 %1720, %v1769_v40   ;;  %v1159_v43 = vpop.f32.mrf.mxu0 }
 0x388   : > { %1195 = vst.msk [vmem:[#allocation7 + $0x28] sm:$0xff] %vm480_vm2, %v1187_v42 }
 0x38c   : > { %v998_v48 = vpop.permute.xlu1 %997 }
 0x38d   : > { %v1011_v51 = vmul.f32 %v998_v48, %v963_v46  ;;  %v1142_v12 = vpop.f32.mrf.mxu3 }
 0x38e   : > { %967 = vperm.xlu1 %1720, %v2438_v63   ;;  %v1161_v53 = vpop.f32.mrf.mxu0 }
 0x38f   : > { %v1188_v17 = vadd.f32 %v1159_v43, %v1011_v51  ;;  %v1230_v4 = vld [vmem:[#allocation7 + $0x28] sm:$0xff] }
 0x391   : > { %1196 = vst.msk [vmem:[#allocation7 + $0x30] sm:$0xff] %vm480_vm2, %v1188_v17 }
 0x398   : > { %v1231_v52 = vld [vmem:[#allocation7 + $0x30] sm:$0xff] }
 0x3a3   : > { %v1241_v2 = vpop.permute.xlu2 %1240 }
 0x3a4   : > { %v1274_v22 = vmul.f32 %v1241_v2, %v1226_v55 }
 0x3a6   : > { %v1282_v56 = vpack.c.bf16 %v1274_v22, %v1274_v22 }
 0x3a8   : > { %1291 = vrot.lane.b32.xlu2 %v1282_v56, %s2039_s3 }
 0x3ab   : > { %v1256_v50 = vpop.permute.xlu2 %1255 }
 0x3ac   : > { %v1277_v14 = vmul.f32 %v1256_v50, %v1229_v57 }
 0x3ae   : > { %v1285_v58 = vpack.c.bf16 %v1277_v14, %v1277_v14 }
 0x3b0   : > { %1309 = vrot.lane.b32.xlu2 %v1285_v58, %s2040_s4 }
 0x3b3   : > { %v1271_v62 = vpop.permute.xlu2 %1270 }
 0x3b4   : > { %v1280_v60 = vmul.f32 %v1271_v62, %v1232_v59  ;;  %v1251_v63 = vpop.permute.xlu0 %1250 }
 0x3b5   : > { %v1276_v0 = vmul.f32 %v1251_v63, %v1228_v61 }
 0x3b6   : > { %v1288_v21 = vpack.c.bf16 %v1280_v60, %v1280_v60 }
 0x3b7   : > { %v1284_v1 = vpack.c.bf16 %v1276_v0, %v1276_v0 }
 0x3b8   : > { %1327 = vrot.lane.b32.xlu2 %v1288_v21, %s2041_s23 }
 0x3b9   : > { %1303 = vrot.lane.b32.xlu0 %v1284_v1, %s2042_s25  ;;  %v1246_v8 = vpop.permute.xlu1 %1245 }
 0x3ba   : > { %v1275_v16 = vmul.f32 %v1246_v8, %v1227_v9 }
 0x3bc   : > { %v1283_v44 = vpack.c.bf16 %v1275_v16, %v1275_v16 }
 0x3be   : > { %1297 = vrot.lane.b32.xlu1 %v1283_v44, %s2043_s27 }
 0x3c4   : > { %v1266_v47 = vpop.permute.xlu0 %1265 }
 0x3c5   : > { %v1279_v18 = vmul.f32 %v1266_v47, %v1231_v52 }
 0x3c7   : > { %v1287_v3 = vpack.c.bf16 %v1279_v18, %v1279_v18 }
 0x3c9   : > { %1321 = vrot.lane.b32.xlu0 %v1287_v3, %s2044_s7 }
 0x3cc   : > { %v1236_v27 = vpop.permute.xlu0 %1235 }
 0x3f8   : > { %v1261_v23 = vpop.permute.xlu1 %1260 }
 0x3f9   : > { %v1278_v6 = vmul.f32 %v1261_v23, %v1230_v4 }
 0x3fb   : > { %v1286_v13 = vpack.c.bf16 %v1278_v6, %v1278_v6 }
 0x3fd   : > { %1315 = vrot.lane.b32.xlu1 %v1286_v13, %s2045_s10 }
 0x400   : > { %v968_v24 = vpop.permute.xlu1 %967 }
 0x401   : > { %v1005_v25 = vmul.f32 %v968_v24, %v957_v15 }
 0x402   : > { %v1292_v20 = vpop.permute.xlu2 %1291 }
 0x403   : > { %v1182_v26 = vadd.f32 %v2435_v19, %v1005_v25 }
 0x405   : > { %1190 = vst.msk [vmem:[#allocation7] sm:$0xff] %vm480_vm2, %v1182_v26 }
 0x40a   : > { %v1310_v19 = vpop.permute.xlu2 %1309 }
 0x40c   : > { %v1225_v28 = vld [vmem:[#allocation7] sm:$0xff] }
 0x40d   : > { %v1273_v29 = vmul.f32 %v1236_v27, %v1225_v28 }
 0x40f   : > { %v1281_v11 = vpack.c.bf16 %v1273_v29, %v1273_v29 }
 0x411   : > { %1289 = vst.msk [vmem:[#allocation8] sm:$0xf] %vm425_vm1, %v1281_v11 }
 0x412   : > { %1295 = vst.msk [vmem:[#allocation8] sm:$0xf] %vm1294_vm6, %v1292_v20  ;;  %v1328_v10 = vpop.permute.xlu2 %1327 }
 0x42b   : > { %v1304_v32 = vpop.permute.xlu0 %1303 }
 0x430   : > { %v1298_v31 = vpop.permute.xlu1 %1297 }
 0x431   : > { %1301 = vst.msk [vmem:[#allocation8] sm:$0xf] %vm1300_vm7, %v1298_v31 }
 0x432   : > { %1307 = vst.msk [vmem:[#allocation8] sm:$0xf] %vm1306_vm8, %v1304_v32 }
 0x433   : > { %1313 = vst.msk [vmem:[#allocation8] sm:$0xf] %vm1312_vm9, %v1310_v19 }
 0x43b   : > { %v1322_v35 = vpop.permute.xlu0 %1321 }
 0x46f   : > { %v1316_v34 = vpop.permute.xlu1 %1315 }
 0x470   : > { %1319 = vst.msk [vmem:[#allocation8] sm:$0xf] %vm1318_vm10, %v1316_v34 }
 0x471   : > { %1325 = vst.msk [vmem:[#allocation8] sm:$0xf] %vm1324_vm11, %v1322_v35 }
 0x472   : > { %1331 = vst.msk [vmem:[#allocation8] sm:$0xf] %vm1330_vm12, %v1328_v10 }
 0x479   : > { %v1332_v36 = vld [vmem:[#allocation8] sm:$0xf] }
 0x47a   : > { %1582 = vmatmul.msk.bf16.vlgmr.msra.gmra.mxu2 %vm407_vm0, %v1332_v36 }
 0x4fd   : > { %v1365_v37 = vpop.f32.mrf.mxu2 }
 0x4fe   : > { %v1366_v38 = vadd.f32 %v1721_v5, %v1365_v37 }
 0x500   : > { %1369 = vst.msk [vmem:[%s383_s29] sm:$0xff] %vm407_vm0, %v1366_v38 }
 0x501   : > { %1947 = shalt.err (!%p1944_p13)
}
 0x502   : > { %1609 = dma.vmem_to_hbm [thread:$0]  (%p2168_p4), %s1385_s30, 128, %s1387_s12, %s1371_s9  }
 0x505   : > { %v1367_v39 = vpop.f32.mrf.mxu2 }
 0x506 PF: > { %s1398_s11 = sand.u32 1, %s1994_s21   ;;  %p1629_p0 = pnand %p1528_p6, %p2176_p7 }
 0x507   : > { %s1399_s25 = scalar_lea.sflag [#allocation11], %s1398_s11 }
 0x508   : > { %p1630_p2 = pneg %p1629_p0 }
 0x50a   : > { %1989 = dma.done.wait (%p1630_p2), %s1399_s25, 128  }
 0x50b   : > { %1991 = vsyncadd (%p1630_p2), %s1399_s25, 4294967168  ;;  %s26_s26 = sadd.s32 1, %s2014_s26   ;;  %s2545_s27 = sld [smem:[#allocation24_spill]] }
 0x50c   : > { %p23_p5 = scmp.ge.s32.totalorder %s26_s26, 4   ;;  %s2546_s23 = sld [smem:[#allocation27_spill]] }
 0x50d   : > { %s2547_s24 = sld [smem:[#allocation25_spill]]  ;;  %s2549_s21 = smov %s1998_s22 }
 0x50e   : > { %s2548_s25 = sld [smem:[#allocation26_spill]]  ;;  %25 = sbr.rel (!%p23_p5) target bundleno = 13 (0xd), region = 143 }
 0x511   : > { %s2550_s22 = smov %s2545_s27 }
 0x513   :  { %1405 = vsyncpa [#allocation10], 1 }
 0x514   :  { %1407 = vsyncpa [#allocation10 + $0x1], 1 }
 0x515   :  { %1408 = vsyncpa [#allocation13], 1 }
 0x516   :  { %1410 = vsyncpa [#allocation13 + $0x1], 1 }
 0x517   :  { %1411 = vsyncpa [#allocation16], 1 }
 0x518   :  { %1412 = vsyncpa [#allocation11], 1 }
 0x519   :  { %1414 = vsyncpa [#allocation11 + $0x1], 1 }

</bundles_post_ra>
